<compile_context>
chip_gen: v6e
topology: v6e:2x2x1
jax: 0.10.0
libtpu: 0.0.40
codegen_flags: <defaults>
</compile_context>

<pallas_src>
import functools

import jax
import jax.numpy as jnp
from jax.experimental import pallas as pl
from jax.experimental.pallas import tpu as pltpu


def _compl_mul_kernel(x_ref, w_ref, o_ref, *, reg_acc):
    # x_ref: (2, Cin, B,    Mt)  real/imag packed on axis 0, corners folded in Mt
    # w_ref: (2, Cin, Cout, Mt)
    # o_ref: (2, B,   Cout, Mt)
    # out[b, o, m] = sum_i x[b, i, m] * w[i, o, m]   (complex, per lane m)
    cin = x_ref.shape[1]

    if reg_acc:
        acc_r = jnp.zeros(o_ref.shape[1:], jnp.float32)
        acc_i = jnp.zeros(o_ref.shape[1:], jnp.float32)
        # Cin is small & static: unrolled loop, leading-axis Ref loads (no
        # mid-axis slicing / relayout), 3-D broadcasts on the VPU.
        for i in range(cin):
            xr = x_ref[0, i][:, None, :]   # (B, 1, Mt)
            xi = x_ref[1, i][:, None, :]
            wr = w_ref[0, i][None, :, :]   # (1, Cout, Mt)
            wi = w_ref[1, i][None, :, :]
            acc_r = acc_r + (xr * wr - xi * wi)
            acc_i = acc_i + (xr * wi + xi * wr)
        o_ref[0] = acc_r
        o_ref[1] = acc_i
    else:
        # Large B*Cout*Mt: keep the accumulator VMEM-resident (the output
        # block) so the register live-set stays bounded.
        o_ref[...] = jnp.zeros(o_ref.shape, jnp.float32)
        for i in range(cin):
            xr = x_ref[0, i][:, None, :]
            xi = x_ref[1, i][:, None, :]
            wr = w_ref[0, i][None, :, :]
            wi = w_ref[1, i][None, :, :]
            o_ref[0] += xr * wr - xi * wi
            o_ref[1] += xr * wi + xi * wr


def _choose_m_tile(b, cin, cout, m_total, budget_bytes=12 << 20):
    """Lane-tile of the folded mode axis: multiple of 128, sized so the
    double-buffered (x, w, out) f32 r/i-packed blocks fit `budget_bytes`
    (safe on v7x's 64 MiB VMEM, plenty of slack on v5e/v6e's 128 MiB)."""
    per_lane = 4 * 2 * 2 * (cin * b + cin * cout + b * cout)  # f32 * r/i * dbl-buf
    mt = (budget_bytes // per_lane) // 128 * 128
    mt = max(128, min(int(mt), 2048))
    m_pad128 = ((m_total + 127) // 128) * 128
    return min(mt, m_pad128)


def _corner_compl_mul(cx, cw, mt):
    # cx: (2, Cin, B,    Mpad)
    # cw: (2, Cin, Cout, Mpad)
    _, cin, b, m_pad = cx.shape
    cout = cw.shape[2]
    grid = (m_pad // mt,)

    x_spec = pl.BlockSpec((2, cin, b, mt), lambda j: (0, 0, 0, j))
    w_spec = pl.BlockSpec((2, cin, cout, mt), lambda j: (0, 0, 0, j))
    o_spec = pl.BlockSpec((2, b, cout, mt), lambda j: (0, 0, 0, j))

    # Keep accumulators in vregs only when they comfortably fit.
    reg_acc = (2 * b * cout * mt * 4) <= (96 * 1024)

    block_bytes = 4 * 2 * mt * (cin * b + cin * cout + b * cout)
    vmem_bytes = int(min(4 * block_bytes + (8 << 20), 48 << 20))

    cost = pl.CostEstimate(
        flops=8 * b * cin * cout * m_pad,
        transcendentals=0,
        bytes_accessed=4 * 2 * m_pad * (cin * b + cin * cout + b * cout),
    )

    return pl.pallas_call(
        functools.partial(_compl_mul_kernel, reg_acc=reg_acc),
        out_shape=jax.ShapeDtypeStruct((2, b, cout, m_pad), jnp.float32),
        grid_spec=pltpu.PrefetchScalarGridSpec(
            num_scalar_prefetch=0,
            grid=grid,
            in_specs=[x_spec, w_spec],
            out_specs=o_spec,
        ),
        compiler_params=pltpu.CompilerParams(
            dimension_semantics=("parallel",),   # lane tiles are independent
            vmem_limit_bytes=vmem_bytes,
        ),
        cost_estimate=cost,
    )(cx, cw)


def spectral_conv3d(x, weights_r, weights_i, modes1, modes2, modes3):
    """x: (B, Cin, D1, D2, D3) float32.
    weights_r/weights_i: (4, Cin, Cout, m1, m2, m3) float32 (real/imag of w1..w4).
    Returns (B, Cout, D1, D2, D3) float32."""
    B, Cin, D1, D2, D3 = x.shape
    Cout = weights_r.shape[2]
    m1, m2, m3 = modes1, modes2, modes3
    assert m1 <= D1 and m2 <= D2 and m3 <= D3 // 2 + 1, "modes exceed FFT grid"
    M = m1 * m2 * m3
    Mtot = 4 * M  # 4 corners folded into the lane axis (corner-major)

    # TODO(synk): rfftn/irfftn have no clean Pallas equivalent; done in plain JAX.
    x_ft = jnp.fft.rfftn(x, axes=(-3, -2, -1))  # (B, Cin, D1, D2, D3//2+1) complex64

    # Gather the 4 low-frequency corners, fold them into one lane-dense last
    # axis, and put Cin leading (matches the kernel's leading-axis loads).
    corners = jnp.stack(
        [
            x_ft[:, :, :m1, :m2, :m3],
            x_ft[:, :, -m1:, :m2, :m3],
            x_ft[:, :, :m1, -m2:, :m3],
            x_ft[:, :, -m1:, -m2:, :m3],
        ],
        axis=2,
    )  # (B, Cin, 4, m1, m2, m3)
    corners = jnp.transpose(corners.reshape(B, Cin, Mtot), (1, 0, 2))  # (Cin, B, Mtot)
    cx = jnp.stack(
        [jnp.real(corners), jnp.imag(corners)], axis=0
    ).astype(jnp.float32)  # (2, Cin, B, Mtot)

    cw = jnp.stack([weights_r, weights_i], axis=0)          # (2, 4, Cin, Cout, m1,m2,m3)
    cw = cw.reshape(2, 4, Cin, Cout, M)
    cw = jnp.transpose(cw, (0, 2, 3, 1, 4)).reshape(2, Cin, Cout, Mtot)
    cw = cw.astype(jnp.float32)                              # (2, Cin, Cout, Mtot)

    # Lane tiling: zero-pad the folded mode axis to a multiple of the tile.
    mt = _choose_m_tile(B, Cin, Cout, Mtot)
    Mpad = ((Mtot + mt - 1) // mt) * mt
    if Mpad != Mtot:
        cx = jnp.pad(cx, ((0, 0), (0, 0), (0, 0), (0, Mpad - Mtot)))
        cw = jnp.pad(cw, ((0, 0), (0, 0), (0, 0), (0, Mpad - Mtot)))

    out = _corner_compl_mul(cx, cw, mt)                      # (2, B, Cout, Mpad)

    out = out[..., :Mtot].reshape(2, B, Cout, 4, m1, m2, m3)
    out_c = jax.lax.complex(out[0], out[1])                  # (B, Cout, 4, m1,m2,m3)

    out_ft = jnp.zeros((B, Cout, D1, D2, D3 // 2 + 1), jnp.complex64)
    out_ft = out_ft.at[:, :, :m1, :m2, :m3].set(out_c[:, :, 0])
    out_ft = out_ft.at[:, :, -m1:, :m2, :m3].set(out_c[:, :, 1])
    out_ft = out_ft.at[:, :, :m1, -m2:, :m3].set(out_c[:, :, 2])
    out_ft = out_ft.at[:, :, -m1:, -m2:, :m3].set(out_c[:, :, 3])

    return jnp.fft.irfftn(out_ft, s=(D1, D2, D3), axes=(-3, -2, -1)).astype(jnp.float32)


def _reference(x, weights_r, weights_i, m1, m2, m3):
    # Pure-JAX reference mirroring the PyTorch forward (for correctness check).
    B, Cin, D1, D2, D3 = x.shape
    Cout = weights_r.shape[2]
    w = weights_r.astype(jnp.complex64) + 1j * weights_i.astype(jnp.complex64)
    x_ft = jnp.fft.rfftn(x, axes=(-3, -2, -1))
    out_ft = jnp.zeros((B, Cout, D1, D2, D3 // 2 + 1), jnp.complex64)

    def cm(inp, ww):
        return jnp.einsum("bixyz,ioxyz->boxyz", inp, ww)

    out_ft = out_ft.at[:, :, :m1, :m2, :m3].set(cm(x_ft[:, :, :m1, :m2, :m3], w[0]))
    out_ft = out_ft.at[:, :, -m1:, :m2, :m3].set(cm(x_ft[:, :, -m1:, :m2, :m3], w[1]))
    out_ft = out_ft.at[:, :, :m1, -m2:, :m3].set(cm(x_ft[:, :, :m1, -m2:, :m3], w[2]))
    out_ft = out_ft.at[:, :, -m1:, -m2:, :m3].set(cm(x_ft[:, :, -m1:, -m2:, :m3], w[3]))
    return jnp.fft.irfftn(out_ft, s=(D1, D2, D3), axes=(-3, -2, -1)).astype(jnp.float32)


if __name__ == "__main__":
    # Small, deterministic config (synthetic weights; mirrors nn.Module __init__).
    B, Cin, Cout = 2, 4, 4
    D1 = D2 = D3 = 16
    m1 = m2 = m3 = 4
    scale = 1.0 / (Cin * Cout)

    key = jax.random.PRNGKey(0)
    kx, kwr, kwi = jax.random.split(key, 3)

    x = jax.random.normal(kx, (B, Cin, D1, D2, D3), dtype=jnp.float32)
    # torch.rand(..., dtype=cfloat): uniform [0,1) real & imag, scaled by `scale`.
    weights_r = scale * jax.random.uniform(kwr, (4, Cin, Cout, m1, m2, m3), dtype=jnp.float32)
    weights_i = scale * jax.random.uniform(kwi, (4, Cin, Cout, m1, m2, m3), dtype=jnp.float32)

    fn = jax.jit(lambda xx: spectral_conv3d(xx, weights_r, weights_i, m1, m2, m3))
    out = jax.block_until_ready(fn(x))

    ref = jax.block_until_ready(_reference(x, weights_r, weights_i, m1, m2, m3))
    assert out.shape == (B, Cout, D1, D2, D3)
    assert jnp.allclose(out, ref, atol=1e-4, rtol=1e-4), "mismatch vs reference"

    print("KERNEL_OK")
</pallas_src>

<mosaic_0001>
module attributes {stable_mosaic.version = 11 : i64} {
  func.func @_compl_mul_kernel(%arg0: i32, %arg1: memref<2x4x2x256xf32, #tpu.memory_space<vmem>>, %arg2: memref<2x4x4x256xf32, #tpu.memory_space<vmem>>, %arg3: memref<2x2x4x256xf32, #tpu.memory_space<vmem>>) attributes {dimension_semantics = [#tpu.dimension_semantics<parallel>], iteration_bounds = array<i64: 1>, scalar_prefetch = 0 : i64, scratch_operands = 0 : i64, tpu.core_type = #tpu.core_type<tc>, window_params = [{transform_indices = @transform_0, window_bounds = array<i64: 2, 4, 2, 256>}, {transform_indices = @transform_1, window_bounds = array<i64: 2, 4, 4, 256>}, {transform_indices = @transform_2, window_bounds = array<i64: 2, 2, 4, 256>}]} {
    %cst = arith.constant 0.000000e+00 : f32
    %0 = vector.broadcast %cst : f32 to vector<2x4x256xf32>
    %cst_0 = arith.constant 0.000000e+00 : f32
    %1 = vector.broadcast %cst_0 : f32 to vector<2x4x256xf32>
    %c0 = arith.constant 0 : index
    %c0_1 = arith.constant 0 : index
    %c0_2 = arith.constant 0 : index
    %c0_3 = arith.constant 0 : index
    %2 = vector.load %arg1[%c0, %c0_1, %c0_2, %c0_3] : memref<2x4x2x256xf32, #tpu.memory_space<vmem>>, vector<1x1x2x256xf32>
    %3 = vector.shape_cast %2 : vector<1x1x2x256xf32> to vector<2x256xf32>
    %4 = vector.shape_cast %3 : vector<2x256xf32> to vector<2x1x256xf32>
    %c1 = arith.constant 1 : index
    %c0_4 = arith.constant 0 : index
    %c0_5 = arith.constant 0 : index
    %c0_6 = arith.constant 0 : index
    %5 = vector.load %arg1[%c1, %c0_4, %c0_5, %c0_6] : memref<2x4x2x256xf32, #tpu.memory_space<vmem>>, vector<1x1x2x256xf32>
    %6 = vector.shape_cast %5 : vector<1x1x2x256xf32> to vector<2x256xf32>
    %7 = vector.shape_cast %6 : vector<2x256xf32> to vector<2x1x256xf32>
    %c0_7 = arith.constant 0 : index
    %c0_8 = arith.constant 0 : index
    %c0_9 = arith.constant 0 : index
    %c0_10 = arith.constant 0 : index
    %8 = vector.load %arg2[%c0_7, %c0_8, %c0_9, %c0_10] : memref<2x4x4x256xf32, #tpu.memory_space<vmem>>, vector<1x1x4x256xf32>
    %9 = vector.shape_cast %8 : vector<1x1x4x256xf32> to vector<4x256xf32>
    %10 = vector.shape_cast %9 : vector<4x256xf32> to vector<1x4x256xf32>
    %c1_11 = arith.constant 1 : index
    %c0_12 = arith.constant 0 : index
    %c0_13 = arith.constant 0 : index
    %c0_14 = arith.constant 0 : index
    %11 = vector.load %arg2[%c1_11, %c0_12, %c0_13, %c0_14] : memref<2x4x4x256xf32, #tpu.memory_space<vmem>>, vector<1x1x4x256xf32>
    %12 = vector.shape_cast %11 : vector<1x1x4x256xf32> to vector<4x256xf32>
    %13 = vector.shape_cast %12 : vector<4x256xf32> to vector<1x4x256xf32>
    %14 = vector.broadcast %4 : vector<2x1x256xf32> to vector<2x4x256xf32>
    %15 = vector.broadcast %10 : vector<1x4x256xf32> to vector<2x4x256xf32>
    %16 = arith.mulf %14, %15 : vector<2x4x256xf32>
    %17 = vector.broadcast %7 : vector<2x1x256xf32> to vector<2x4x256xf32>
    %18 = vector.broadcast %13 : vector<1x4x256xf32> to vector<2x4x256xf32>
    %19 = arith.mulf %17, %18 : vector<2x4x256xf32>
    %20 = arith.subf %16, %19 : vector<2x4x256xf32>
    %21 = arith.addf %0, %20 : vector<2x4x256xf32>
    %22 = vector.broadcast %4 : vector<2x1x256xf32> to vector<2x4x256xf32>
    %23 = vector.broadcast %13 : vector<1x4x256xf32> to vector<2x4x256xf32>
    %24 = arith.mulf %22, %23 : vector<2x4x256xf32>
    %25 = vector.broadcast %7 : vector<2x1x256xf32> to vector<2x4x256xf32>
    %26 = vector.broadcast %10 : vector<1x4x256xf32> to vector<2x4x256xf32>
    %27 = arith.mulf %25, %26 : vector<2x4x256xf32>
    %28 = arith.addf %24, %27 : vector<2x4x256xf32>
    %29 = arith.addf %1, %28 : vector<2x4x256xf32>
    %c0_15 = arith.constant 0 : index
    %c1_16 = arith.constant 1 : index
    %c0_17 = arith.constant 0 : index
    %c0_18 = arith.constant 0 : index
    %30 = vector.load %arg1[%c0_15, %c1_16, %c0_17, %c0_18] : memref<2x4x2x256xf32, #tpu.memory_space<vmem>>, vector<1x1x2x256xf32>
    %31 = vector.shape_cast %30 : vector<1x1x2x256xf32> to vector<2x256xf32>
    %32 = vector.shape_cast %31 : vector<2x256xf32> to vector<2x1x256xf32>
    %c1_19 = arith.constant 1 : index
    %c1_20 = arith.constant 1 : index
    %c0_21 = arith.constant 0 : index
    %c0_22 = arith.constant 0 : index
    %33 = vector.load %arg1[%c1_19, %c1_20, %c0_21, %c0_22] : memref<2x4x2x256xf32, #tpu.memory_space<vmem>>, vector<1x1x2x256xf32>
    %34 = vector.shape_cast %33 : vector<1x1x2x256xf32> to vector<2x256xf32>
    %35 = vector.shape_cast %34 : vector<2x256xf32> to vector<2x1x256xf32>
    %c0_23 = arith.constant 0 : index
    %c1_24 = arith.constant 1 : index
    %c0_25 = arith.constant 0 : index
    %c0_26 = arith.constant 0 : index
    %36 = vector.load %arg2[%c0_23, %c1_24, %c0_25, %c0_26] : memref<2x4x4x256xf32, #tpu.memory_space<vmem>>, vector<1x1x4x256xf32>
    %37 = vector.shape_cast %36 : vector<1x1x4x256xf32> to vector<4x256xf32>
    %38 = vector.shape_cast %37 : vector<4x256xf32> to vector<1x4x256xf32>
    %c1_27 = arith.constant 1 : index
    %c1_28 = arith.constant 1 : index
    %c0_29 = arith.constant 0 : index
    %c0_30 = arith.constant 0 : index
    %39 = vector.load %arg2[%c1_27, %c1_28, %c0_29, %c0_30] : memref<2x4x4x256xf32, #tpu.memory_space<vmem>>, vector<1x1x4x256xf32>
    %40 = vector.shape_cast %39 : vector<1x1x4x256xf32> to vector<4x256xf32>
    %41 = vector.shape_cast %40 : vector<4x256xf32> to vector<1x4x256xf32>
    %42 = vector.broadcast %32 : vector<2x1x256xf32> to vector<2x4x256xf32>
    %43 = vector.broadcast %38 : vector<1x4x256xf32> to vector<2x4x256xf32>
    %44 = arith.mulf %42, %43 : vector<2x4x256xf32>
    %45 = vector.broadcast %35 : vector<2x1x256xf32> to vector<2x4x256xf32>
    %46 = vector.broadcast %41 : vector<1x4x256xf32> to vector<2x4x256xf32>
    %47 = arith.mulf %45, %46 : vector<2x4x256xf32>
    %48 = arith.subf %44, %47 : vector<2x4x256xf32>
    %49 = arith.addf %21, %48 : vector<2x4x256xf32>
    %50 = vector.broadcast %32 : vector<2x1x256xf32> to vector<2x4x256xf32>
    %51 = vector.broadcast %41 : vector<1x4x256xf32> to vector<2x4x256xf32>
    %52 = arith.mulf %50, %51 : vector<2x4x256xf32>
    %53 = vector.broadcast %35 : vector<2x1x256xf32> to vector<2x4x256xf32>
    %54 = vector.broadcast %38 : vector<1x4x256xf32> to vector<2x4x256xf32>
    %55 = arith.mulf %53, %54 : vector<2x4x256xf32>
    %56 = arith.addf %52, %55 : vector<2x4x256xf32>
    %57 = arith.addf %29, %56 : vector<2x4x256xf32>
    %c0_31 = arith.constant 0 : index
    %c2 = arith.constant 2 : index
    %c0_32 = arith.constant 0 : index
    %c0_33 = arith.constant 0 : index
    %58 = vector.load %arg1[%c0_31, %c2, %c0_32, %c0_33] : memref<2x4x2x256xf32, #tpu.memory_space<vmem>>, vector<1x1x2x256xf32>
    %59 = vector.shape_cast %58 : vector<1x1x2x256xf32> to vector<2x256xf32>
    %60 = vector.shape_cast %59 : vector<2x256xf32> to vector<2x1x256xf32>
    %c1_34 = arith.constant 1 : index
    %c2_35 = arith.constant 2 : index
    %c0_36 = arith.constant 0 : index
    %c0_37 = arith.constant 0 : index
    %61 = vector.load %arg1[%c1_34, %c2_35, %c0_36, %c0_37] : memref<2x4x2x256xf32, #tpu.memory_space<vmem>>, vector<1x1x2x256xf32>
    %62 = vector.shape_cast %61 : vector<1x1x2x256xf32> to vector<2x256xf32>
    %63 = vector.shape_cast %62 : vector<2x256xf32> to vector<2x1x256xf32>
    %c0_38 = arith.constant 0 : index
    %c2_39 = arith.constant 2 : index
    %c0_40 = arith.constant 0 : index
    %c0_41 = arith.constant 0 : index
    %64 = vector.load %arg2[%c0_38, %c2_39, %c0_40, %c0_41] : memref<2x4x4x256xf32, #tpu.memory_space<vmem>>, vector<1x1x4x256xf32>
    %65 = vector.shape_cast %64 : vector<1x1x4x256xf32> to vector<4x256xf32>
    %66 = vector.shape_cast %65 : vector<4x256xf32> to vector<1x4x256xf32>
    %c1_42 = arith.constant 1 : index
    %c2_43 = arith.constant 2 : index
    %c0_44 = arith.constant 0 : index
    %c0_45 = arith.constant 0 : index
    %67 = vector.load %arg2[%c1_42, %c2_43, %c0_44, %c0_45] : memref<2x4x4x256xf32, #tpu.memory_space<vmem>>, vector<1x1x4x256xf32>
    %68 = vector.shape_cast %67 : vector<1x1x4x256xf32> to vector<4x256xf32>
    %69 = vector.shape_cast %68 : vector<4x256xf32> to vector<1x4x256xf32>
    %70 = vector.broadcast %60 : vector<2x1x256xf32> to vector<2x4x256xf32>
    %71 = vector.broadcast %66 : vector<1x4x256xf32> to vector<2x4x256xf32>
    %72 = arith.mulf %70, %71 : vector<2x4x256xf32>
    %73 = vector.broadcast %63 : vector<2x1x256xf32> to vector<2x4x256xf32>
    %74 = vector.broadcast %69 : vector<1x4x256xf32> to vector<2x4x256xf32>
    %75 = arith.mulf %73, %74 : vector<2x4x256xf32>
    %76 = arith.subf %72, %75 : vector<2x4x256xf32>
    %77 = arith.addf %49, %76 : vector<2x4x256xf32>
    %78 = vector.broadcast %60 : vector<2x1x256xf32> to vector<2x4x256xf32>
    %79 = vector.broadcast %69 : vector<1x4x256xf32> to vector<2x4x256xf32>
    %80 = arith.mulf %78, %79 : vector<2x4x256xf32>
    %81 = vector.broadcast %63 : vector<2x1x256xf32> to vector<2x4x256xf32>
    %82 = vector.broadcast %66 : vector<1x4x256xf32> to vector<2x4x256xf32>
    %83 = arith.mulf %81, %82 : vector<2x4x256xf32>
    %84 = arith.addf %80, %83 : vector<2x4x256xf32>
    %85 = arith.addf %57, %84 : vector<2x4x256xf32>
    %c0_46 = arith.constant 0 : index
    %c3 = arith.constant 3 : index
    %c0_47 = arith.constant 0 : index
    %c0_48 = arith.constant 0 : index
    %86 = vector.load %arg1[%c0_46, %c3, %c0_47, %c0_48] : memref<2x4x2x256xf32, #tpu.memory_space<vmem>>, vector<1x1x2x256xf32>
    %87 = vector.shape_cast %86 : vector<1x1x2x256xf32> to vector<2x256xf32>
    %88 = vector.shape_cast %87 : vector<2x256xf32> to vector<2x1x256xf32>
    %c1_49 = arith.constant 1 : index
    %c3_50 = arith.constant 3 : index
    %c0_51 = arith.constant 0 : index
    %c0_52 = arith.constant 0 : index
    %89 = vector.load %arg1[%c1_49, %c3_50, %c0_51, %c0_52] : memref<2x4x2x256xf32, #tpu.memory_space<vmem>>, vector<1x1x2x256xf32>
    %90 = vector.shape_cast %89 : vector<1x1x2x256xf32> to vector<2x256xf32>
    %91 = vector.shape_cast %90 : vector<2x256xf32> to vector<2x1x256xf32>
    %c0_53 = arith.constant 0 : index
    %c3_54 = arith.constant 3 : index
    %c0_55 = arith.constant 0 : index
    %c0_56 = arith.constant 0 : index
    %92 = vector.load %arg2[%c0_53, %c3_54, %c0_55, %c0_56] : memref<2x4x4x256xf32, #tpu.memory_space<vmem>>, vector<1x1x4x256xf32>
    %93 = vector.shape_cast %92 : vector<1x1x4x256xf32> to vector<4x256xf32>
    %94 = vector.shape_cast %93 : vector<4x256xf32> to vector<1x4x256xf32>
    %c1_57 = arith.constant 1 : index
    %c3_58 = arith.constant 3 : index
    %c0_59 = arith.constant 0 : index
    %c0_60 = arith.constant 0 : index
    %95 = vector.load %arg2[%c1_57, %c3_58, %c0_59, %c0_60] : memref<2x4x4x256xf32, #tpu.memory_space<vmem>>, vector<1x1x4x256xf32>
    %96 = vector.shape_cast %95 : vector<1x1x4x256xf32> to vector<4x256xf32>
    %97 = vector.shape_cast %96 : vector<4x256xf32> to vector<1x4x256xf32>
    %98 = vector.broadcast %88 : vector<2x1x256xf32> to vector<2x4x256xf32>
    %99 = vector.broadcast %94 : vector<1x4x256xf32> to vector<2x4x256xf32>
    %100 = arith.mulf %98, %99 : vector<2x4x256xf32>
    %101 = vector.broadcast %91 : vector<2x1x256xf32> to vector<2x4x256xf32>
    %102 = vector.broadcast %97 : vector<1x4x256xf32> to vector<2x4x256xf32>
    %103 = arith.mulf %101, %102 : vector<2x4x256xf32>
    %104 = arith.subf %100, %103 : vector<2x4x256xf32>
    %105 = arith.addf %77, %104 : vector<2x4x256xf32>
    %106 = vector.broadcast %88 : vector<2x1x256xf32> to vector<2x4x256xf32>
    %107 = vector.broadcast %97 : vector<1x4x256xf32> to vector<2x4x256xf32>
    %108 = arith.mulf %106, %107 : vector<2x4x256xf32>
    %109 = vector.broadcast %91 : vector<2x1x256xf32> to vector<2x4x256xf32>
    %110 = vector.broadcast %94 : vector<1x4x256xf32> to vector<2x4x256xf32>
    %111 = arith.mulf %109, %110 : vector<2x4x256xf32>
    %112 = arith.addf %108, %111 : vector<2x4x256xf32>
    %113 = arith.addf %85, %112 : vector<2x4x256xf32>
    %c0_61 = arith.constant 0 : index
    %c0_62 = arith.constant 0 : index
    %c0_63 = arith.constant 0 : index
    %c0_64 = arith.constant 0 : index
    %114 = vector.load %arg3[%c0_61, %c0_62, %c0_63, %c0_64] : memref<2x2x4x256xf32, #tpu.memory_space<vmem>>, vector<1x2x4x256xf32>
    %115 = vector.shape_cast %114 : vector<1x2x4x256xf32> to vector<2x4x256xf32>
    %116 = vector.shape_cast %105 : vector<2x4x256xf32> to vector<1x2x4x256xf32>
    tpu.vector_store %arg3[%c0_61, %c0_62, %c0_63, %c0_64], %116 {strides = array<i32>} : memref<2x2x4x256xf32, #tpu.memory_space<vmem>>, vector<1x2x4x256xf32>,
    %c1_65 = arith.constant 1 : index
    %c0_66 = arith.constant 0 : index
    %c0_67 = arith.constant 0 : index
    %c0_68 = arith.constant 0 : index
    %117 = vector.load %arg3[%c1_65, %c0_66, %c0_67, %c0_68] : memref<2x2x4x256xf32, #tpu.memory_space<vmem>>, vector<1x2x4x256xf32>
    %118 = vector.shape_cast %117 : vector<1x2x4x256xf32> to vector<2x4x256xf32>
    %119 = vector.shape_cast %113 : vector<2x4x256xf32> to vector<1x2x4x256xf32>
    tpu.vector_store %arg3[%c1_65, %c0_66, %c0_67, %c0_68], %119 {strides = array<i32>} : memref<2x2x4x256xf32, #tpu.memory_space<vmem>>, vector<1x2x4x256xf32>,
    return
  }
  func.func @transform_0(%arg0: i32) -> (i32, i32, i32, i32) {
    %c0_i32 = arith.constant 0 : i32
    %c0_i32_0 = arith.constant 0 : i32
    %c0_i32_1 = arith.constant 0 : i32
    %c0_i32_2 = arith.constant 0 : i32
    return %c0_i32, %c0_i32_0, %c0_i32_1, %arg0 : i32, i32, i32, i32
  }
  func.func @transform_1(%arg0: i32) -> (i32, i32, i32, i32) {
    %c0_i32 = arith.constant 0 : i32
    %c0_i32_0 = arith.constant 0 : i32
    %c0_i32_1 = arith.constant 0 : i32
    %c0_i32_2 = arith.constant 0 : i32
    return %c0_i32, %c0_i32_0, %c0_i32_1, %arg0 : i32, i32, i32, i32
  }
  func.func @transform_2(%arg0: i32) -> (i32, i32, i32, i32) {
    %c0_i32 = arith.constant 0 : i32
    %c0_i32_0 = arith.constant 0 : i32
    %c0_i32_1 = arith.constant 0 : i32
    %c0_i32_2 = arith.constant 0 : i32
    return %c0_i32, %c0_i32_0, %c0_i32_1, %arg0 : i32, i32, i32, i32
  }
}

</mosaic_0001>

<bundles_post_ra>
// kernel: _lambda_.1
= control target key start
LH: loop header
LB: loop body
LE: loop exit
PB: predicated region body
PF: predicated region fallthrough
CT: control target
= control target key end

     0   :  { %v35_v0 = vlaneseq  ;;  %s845_s0 = inlined_call_operand.vmem [shape: f32[2,4,2,256], index: 0, kind: input, shape index: {}]   ;;  %s846_s1 = inlined_call_operand.vmem [shape: f32[2,4,4,256], index: 1, kind: input, shape index: {}]   ;;  %s847_s2 = inlined_call_operand.vmem [shape: f32[2,2,4,256], index: 2, kind: output, shape index: {}]  }
   0x1   :  { %v450_v1 = vld.sshfl [vmem:[%s845_s0] sm:$0x33 pattern:$0x75316420]  ;;  %v516_v6 = vld [vmem:[%s846_s1 + $0x8] sm:$0xff]  ;;  %v537_v11 = vld [vmem:[%s846_s1 + $0x10] sm:$0xff] }
   0x2   :  { %v503_v2 = vld [vmem:[%s846_s1] sm:$0xff]  ;;  %v452_v4 = vld.sshfl [vmem:[%s845_s0 + $0x10] sm:$0x33 pattern:$0x75316420]  ;;  %v36_v5 = vshrl.u32 %v35_v0, 7  ;;  %v20_v12 = vcombine.high %v450_v1, %v450_v1  ;;  %v548_v16 = vcombine.high %v516_v6, %v516_v6  ;;  %v558_v19 = vcombine.high %v537_v11, %v537_v11 }
   0x3   :  { %v508_v3 = vld [vmem:[%s846_s1 + $0x20] sm:$0xff]  ;;  %v520_v7 = vcombine.high %v503_v2, %v503_v2  ;;  %v532_v10 = vld [vmem:[%s846_s1 + $0x28] sm:$0xff]  ;;  %v457_v15 = vld.sshfl [vmem:[%s845_s0 + $0x14] sm:$0x33 pattern:$0x75316420]  ;;  %v550_v17 = vcombine.high %v452_v4, %v452_v4 }
   0x4   :  { %v524_v8 = vcombine.high %v508_v3, %v508_v3  ;;  %v455_v9 = vld.sshfl [vmem:[%s845_s0 + $0x4] sm:$0x33 pattern:$0x75316420]  ;;  %v539_v13 = vsub.s32 0, %v36_v5  ;;  %v541_v14 = vsub.s32 1, %v36_v5  ;;  %v554_v18 = vcombine.high %v532_v10, %v532_v10 }
   0x5   :  { %v560_v20 = vcombine.high %v455_v9, %v455_v9  ;;  %v562_v21 = vcombine.high %v457_v15, %v457_v15  ;;  %v461_v38 = vld.sshfl [vmem:[%s845_s0 + $0x8] sm:$0x33 pattern:$0x75316420]  ;;  %v610_v39 = vld [vmem:[%s846_s1 + $0x30] sm:$0xff]  ;;  %v633_v50 = vld [vmem:[%s846_s1 + $0x18] sm:$0xff] }
   0x6   :  { %v565_v22 = vrot.slane %v450_v1, %v539_v13  ;;  %v568_v23 = vrot.slane %v450_v1, %v541_v14  ;;  %v571_v24 = vrot.slane %v452_v4, %v539_v13  ;;  %v574_v25 = vrot.slane %v452_v4, %v541_v14  ;;  %v463_v42 = vld.sshfl [vmem:[%s845_s0 + $0x18] sm:$0x33 pattern:$0x75316420] }
   0x7   :  { %v577_v26 = vrot.slane %v455_v9, %v539_v13  ;;  %v580_v27 = vrot.slane %v455_v9, %v541_v14  ;;  %v583_v28 = vrot.slane %v457_v15, %v539_v13  ;;  %v586_v29 = vrot.slane %v457_v15, %v541_v14  ;;  %v467_v49 = vld.sshfl [vmem:[%s845_s0 + $0xc] sm:$0x33 pattern:$0x75316420]  ;;  %v646_v54 = vld [vmem:[%s846_s1 + $0x38] sm:$0xff] }
   0x8   :  { %v58_v30 = vmul.f32 %v565_v22, %v503_v2  ;;  %v59_v31 = vmul.f32 %v520_v7, %v568_v23  ;;  %v85_v32 = vmul.f32 %v508_v3, %v571_v24  ;;  %v86_v33 = vmul.f32 %v524_v8, %v574_v25  ;;  %v469_v59 = vld.sshfl [vmem:[%s845_s0 + $0x1c] sm:$0x33 pattern:$0x75316420] }
   0x9   :  { %v162_v34 = vmul.f32 %v516_v6, %v577_v26  ;;  %v163_v35 = vmul.f32 %v548_v16, %v580_v27  ;;  %v189_v36 = vmul.f32 %v532_v10, %v583_v28  ;;  %v190_v37 = vmul.f32 %v554_v18, %v586_v29 }
   0xa   :  { %v89_v40 = vsub.f32 %v58_v30, %v85_v32  ;;  %v90_v41 = vsub.f32 %v59_v31, %v86_v33  ;;  %v616_v43 = vrot.slane %v461_v38, %v539_v13  ;;  %v619_v44 = vrot.slane %v461_v38, %v541_v14 }
   0xb   :  { %v193_v45 = vsub.f32 %v162_v34, %v189_v36  ;;  %v194_v46 = vsub.f32 %v163_v35, %v190_v37  ;;  %v622_v47 = vrot.slane %v463_v42, %v539_v13  ;;  %v625_v48 = vrot.slane %v463_v42, %v541_v14 }
   0xc   :  { %v266_v51 = vmul.f32 %v537_v11, %v616_v43  ;;  %v267_v52 = vmul.f32 %v558_v19, %v619_v44  ;;  %v641_v53 = vcombine.high %v610_v39, %v610_v39  ;;  %v649_v55 = vrot.slane %v467_v49, %v539_v13 }
   0xd   :  { %v197_v56 = vadd.f32 %v193_v45, %v89_v40  ;;  %v198_v57 = vadd.f32 %v194_v46, %v90_v41  ;;  %v293_v58 = vmul.f32 %v610_v39, %v622_v47  ;;  %v657_v60 = vrot.slane %v467_v49, %v541_v14 }
   0xe   :  { %v294_v61 = vmul.f32 %v641_v53, %v625_v48  ;;  %v663_v62 = vcombine.high %v633_v50, %v633_v50  ;;  %v370_v63 = vmul.f32 %v633_v50, %v649_v55  ;;  %v668_v0 = vrot.slane %v469_v59, %v539_v13 }
   0xf   :  { %v297_v1 = vsub.f32 %v266_v51, %v293_v58  ;;  %v671_v4 = vrot.slane %v469_v59, %v541_v14  ;;  %v675_v5 = vcombine.high %v646_v54, %v646_v54  ;;  %v678_v9 = vrot.slane %v20_v12, %v539_v13 }
  0x10   :  { %v298_v15 = vsub.f32 %v267_v52, %v294_v61  ;;  %v371_v30 = vmul.f32 %v663_v62, %v657_v60  ;;  %v397_v31 = vmul.f32 %v646_v54, %v668_v0  ;;  %v685_v32 = vrot.slane %v20_v12, %v541_v14 }
  0x11   :  { %v301_v33 = vadd.f32 %v297_v1, %v197_v56  ;;  %v398_v34 = vmul.f32 %v675_v5, %v671_v4  ;;  %v60_v35 = vmul.f32 %v678_v9, %v503_v2  ;;  %v693_v36 = vrot.slane %v550_v17, %v539_v13 }
  0x12   :  { %v302_v37 = vadd.f32 %v298_v15, %v198_v57  ;;  %v401_v40 = vsub.f32 %v370_v63, %v397_v31  ;;  %v61_v41 = vmul.f32 %v520_v7, %v685_v32  ;;  %v699_v12 = vrot.slane %v550_v17, %v541_v14 }
  0x13   :  { %v402_v45 = vsub.f32 %v371_v30, %v398_v34  ;;  %v87_v46 = vmul.f32 %v508_v3, %v693_v36  ;;  %v705_v51 = vrot.slane %v560_v20, %v539_v13  ;;  %v709_v52 = vrot.slane %v560_v20, %v541_v14 }
  0x14   :  { %851 = vst [vmem:[#allocation2_spill] sm:$0xff] %v699_v12  ;;  %v405_v56 = vadd.f32 %v401_v40, %v301_v33  ;;  %v88_v57 = vmul.f32 %v524_v8, %v699_v12  ;;  %v715_v17 = vrot.slane %v562_v21, %v539_v13  ;;  %v719_v58 = vrot.slane %v562_v21, %v541_v14 }
  0x15   :  { %v406_v61 = vadd.f32 %v402_v45, %v302_v37  ;;  %v91_v63 = vsub.f32 %v60_v35, %v87_v46  ;;  %v164_v1 = vmul.f32 %v516_v6, %v705_v51  ;;  %v165_v20 = vmul.f32 %v548_v16, %v709_v52 }
  0x16   :  { %v92_v15 = vsub.f32 %v61_v41, %v88_v57  ;;  %v191_v30 = vmul.f32 %v532_v10, %v715_v17  ;;  %v192_v31 = vmul.f32 %v554_v18, %v719_v58  ;;  %v227_v33 = vcombine.high %v461_v38, %v461_v38 }
  0x17   :  { %v429_v34 = vcombine.low %v405_v56, %v406_v61  ;;  %v238_v40 = vcombine.high %v463_v42, %v463_v42  ;;  %v331_v21 = vcombine.high %v467_v49, %v467_v49  ;;  %v342_v12 = vcombine.high %v469_v59, %v469_v59 }
  0x18   :  { %v195_v37 = vsub.f32 %v164_v1, %v191_v30  ;;  %v196_v35 = vsub.f32 %v165_v20, %v192_v31  ;;  %v730_v45 = vrot.slane %v227_v33, %v539_v13  ;;  %v733_v46 = vrot.slane %v227_v33, %v541_v14 }
  0x19   :  { %433 = vst [vmem:[%s847_s2] sm:$0xff] %v429_v34  ;;  %v739_v41 = vrot.slane %v238_v40, %v539_v13  ;;  %v742_v38 = vrot.slane %v238_v40, %v541_v14  ;;  %v745_v42 = vrot.slane %v331_v21, %v539_v13  ;;  %v748_v49 = vrot.slane %v331_v21, %v541_v14 }
  0x1a   :  { %v199_v59 = vadd.f32 %v195_v37, %v91_v63  ;;  %v200_v56 = vadd.f32 %v196_v35, %v92_v15  ;;  %v268_v57 = vmul.f32 %v537_v11, %v730_v45  ;;  %v269_v61 = vmul.f32 %v558_v19, %v733_v46 }
  0x1b   :  { %v295_v1 = vmul.f32 %v610_v39, %v739_v41  ;;  %v296_v20 = vmul.f32 %v641_v53, %v742_v38  ;;  %v372_v30 = vmul.f32 %v633_v50, %v745_v42  ;;  %v373_v31 = vmul.f32 %v663_v62, %v748_v49 }
  0x1c   :  { %v763_v63 = vrot.slane %v342_v12, %v539_v13  ;;  %v766_v15 = vrot.slane %v342_v12, %v541_v14  ;;  %v97_v33 = vmul.f32 %v508_v3, %v565_v22  ;;  %v98_v34 = vmul.f32 %v524_v8, %v568_v23 }
  0x1d   :  { %v299_v40 = vsub.f32 %v268_v57, %v295_v1  ;;  %v300_v21 = vsub.f32 %v269_v61, %v296_v20  ;;  %v101_v37 = vmul.f32 %v571_v24, %v503_v2  ;;  %v102_v35 = vmul.f32 %v574_v25, %v520_v7 }
  0x1e   :  { %852 = vst [vmem:[#allocation3_spill] sm:$0xff] %v763_v63  ;;  %853 = vst [vmem:[#allocation4_spill] sm:$0xff] %v766_v15  ;;  %v399_v13 = vmul.f32 %v646_v54, %v763_v63  ;;  %v400_v14 = vmul.f32 %v675_v5, %v766_v15  ;;  %v201_v22 = vmul.f32 %v532_v10, %v577_v26 }
  0x1f   :  { %v202_v23 = vmul.f32 %v554_v18, %v580_v27  ;;  %v303_v12 = vadd.f32 %v299_v40, %v199_v59  ;;  %v304_v57 = vadd.f32 %v300_v21, %v200_v56  ;;  %v105_v61 = vadd.f32 %v101_v37, %v97_v33 }
  0x20   :  { %v106_v1 = vadd.f32 %v102_v35, %v98_v34  ;;  %v403_v24 = vsub.f32 %v372_v30, %v399_v13  ;;  %v404_v20 = vsub.f32 %v373_v31, %v400_v14  ;;  %v205_v25 = vmul.f32 %v516_v6, %v583_v28 }
  0x21   :  { %v206_v63 = vmul.f32 %v586_v29, %v548_v16  ;;  %v305_v15 = vmul.f32 %v610_v39, %v616_v43  ;;  %v306_v26 = vmul.f32 %v641_v53, %v619_v44  ;;  %v309_v27 = vmul.f32 %v537_v11, %v622_v47 }
  0x22   :  { %v310_v59 = vmul.f32 %v625_v48, %v558_v19  ;;  %v407_v56 = vadd.f32 %v403_v24, %v303_v12  ;;  %v408_v30 = vadd.f32 %v404_v20, %v304_v57  ;;  %v209_v31 = vadd.f32 %v205_v25, %v201_v22 }
  0x23   :  { %v210_v33 = vadd.f32 %v206_v63, %v202_v23  ;;  %v313_v28 = vadd.f32 %v309_v27, %v305_v15  ;;  %v409_v29 = vmul.f32 %v646_v54, %v649_v55  ;;  %v410_v43 = vmul.f32 %v675_v5, %v657_v60 }
  0x24   :  { %v314_v34 = vadd.f32 %v310_v59, %v306_v26  ;;  %v430_v40 = vcombine.low %v407_v56, %v408_v30  ;;  %v213_v44 = vadd.f32 %v209_v31, %v105_v61  ;;  %v413_v47 = vmul.f32 %v633_v50, %v668_v0  ;;  %v854_v0 = vld [vmem:[#allocation2_spill] sm:$0xff] }
  0x25   :  { %v214_v21 = vadd.f32 %v210_v33, %v106_v1  ;;  %v414_v48 = vmul.f32 %v671_v4, %v663_v62  ;;  %v99_v63 = vmul.f32 %v508_v3, %v678_v9  ;;  %v100_v15 = vmul.f32 %v524_v8, %v685_v32 }
  0x26   :  { %v103_v55 = vmul.f32 %v693_v36, %v503_v2  ;;  %434 = vst [vmem:[%s847_s2 + $0x8] sm:$0xff] %v430_v40  ;;  %v317_v60 = vadd.f32 %v313_v28, %v213_v44  ;;  %v417_v35 = vadd.f32 %v413_v47, %v409_v29  ;;  %v104_v13 = vmul.f32 %v854_v0, %v520_v7 }
  0x27   :  { %v318_v37 = vadd.f32 %v314_v34, %v214_v21  ;;  %v418_v4 = vadd.f32 %v414_v48, %v410_v43  ;;  %v203_v3 = vmul.f32 %v532_v10, %v705_v51  ;;  %v204_v8 = vmul.f32 %v554_v18, %v709_v52 }
  0x28   :  { %v107_v14 = vadd.f32 %v103_v55, %v99_v63  ;;  %v421_v9 = vadd.f32 %v417_v35, %v317_v60  ;;  %v108_v2 = vadd.f32 %v104_v13, %v100_v15  ;;  %v207_v32 = vmul.f32 %v516_v6, %v715_v17 }
  0x29   :  { %v208_v36 = vmul.f32 %v719_v58, %v548_v16  ;;  %v422_v22 = vadd.f32 %v418_v4, %v318_v37  ;;  %v307_v7 = vmul.f32 %v610_v39, %v730_v45  ;;  %v308_v23 = vmul.f32 %v641_v53, %v733_v46  ;;  %v855_v39 = vld [vmem:[#allocation3_spill] sm:$0xff] }
  0x2a   :  { %v311_v10 = vmul.f32 %v537_v11, %v739_v41  ;;  %v211_v51 = vadd.f32 %v207_v32, %v203_v3  ;;  %v312_v52 = vmul.f32 %v742_v38, %v558_v19  ;;  %v411_v6 = vmul.f32 %v646_v54, %v745_v42  ;;  %v856_v11 = vld [vmem:[#allocation4_spill] sm:$0xff] }
  0x2b   :  { %v212_v18 = vadd.f32 %v208_v36, %v204_v8  ;;  %v439_v17 = vcombine.low %v421_v9, %v422_v22  ;;  %v412_v58 = vmul.f32 %v675_v5, %v748_v49  ;;  %v415_v45 = vmul.f32 %v633_v50, %v855_v39 }
  0x2c   :  { %v315_v16 = vadd.f32 %v311_v10, %v307_v7  ;;  %v215_v53 = vadd.f32 %v211_v51, %v107_v14  ;;  %v316_v12 = vadd.f32 %v312_v52, %v308_v23  ;;  %v416_v41 = vmul.f32 %v856_v11, %v663_v62 }
  0x2d   :  { %v216_v46 = vadd.f32 %v212_v18, %v108_v2  ;;  %472 = vst [vmem:[%s847_s2 + $0x10] sm:$0xff] %v439_v17  ;;  %v419_v19 = vadd.f32 %v415_v45, %v411_v6 }
  0x2e   :  { %v319_v54 = vadd.f32 %v315_v16, %v215_v53  ;;  %v420_v42 = vadd.f32 %v416_v41, %v412_v58 }
  0x2f   :  { %v320_v38 = vadd.f32 %v316_v12, %v216_v46 }
  0x30   :  { %v423_v57 = vadd.f32 %v419_v19, %v319_v54 }
  0x31   :  { %v424_v61 = vadd.f32 %v420_v42, %v320_v38 }
  0x33   :  { %v440_v5 = vcombine.low %v423_v57, %v424_v61 }
  0x35   :  { %473 = vst [vmem:[%s847_s2 + $0x18] sm:$0xff] %v440_v5 }

// kernel: squeeze.6
= control target key start
LH: loop header
LB: loop body
LE: loop exit
PB: predicated region body
PF: predicated region fallthrough
CT: control target
= control target key end

     0   :  { %s2520_s14 = smov 124   ;;  %vm22_vm0 = vcmask 31744   ;;  %s2521_s15 = smov 116   ;;  %s3534_s0 = inlined_call_operand.vmem [shape: f32[1,2,4,256], index: 0, kind: input, shape index: {}]   ;;  %s3535_s1 = inlined_call_operand.vmem [shape: f32[2,4,4,4,4,4], index: 1, kind: output, shape index: {}]  }
   0x1   :  { %v2360_v0 = vld [vmem:[%s3534_s0 + $0x4] sm:$0xf]  ;;  %v19_v1 = vld [vmem:[%s3534_s0] sm:$0xf]  ;;  %v2358_v2 = vld [vmem:[%s3534_s0 + $0xc] sm:$0xf] }
   0x2   :  { %18 = vst [vmem:[#allocation1 + $0x8] sm:$0xf] %v2360_v0  ;;  %20 = vst [vmem:[#allocation1] sm:$0xf] %v19_v1  ;;  %v2359_v3 = vld [vmem:[%s3534_s0 + $0x8] sm:$0xf] }
   0x3   :  { %9 = vst [vmem:[#allocation1 + $0x18] sm:$0xf] %v2358_v2  ;;  %14 = vst [vmem:[#allocation1 + $0x10] sm:$0xf] %v2359_v3  ;;  %s2519_s0 = smov 120   ;;  %s2522_s16 = smov 112  }
   0x4   :  { %s2523_s17 = smov 108   ;;  %s2524_s18 = smov 104  }
   0x5   :  { %s2525_s19 = smov 100   ;;  %s2526_s20 = smov 96  }
   0x6   :  { %s2527_s21 = smov 92   ;;  %s2528_s22 = smov 88  }
   0x7   :  { %s2529_s23 = smov 84   ;;  %s2530_s24 = smov 80  }
   0x8   :  { %s2531_s25 = smov 76   ;;  %s2532_s26 = smov 72  }
   0x9   :  { %v2572_v4 = vld.sshfl [vmem:[#allocation1] sm:$0xff pattern:$0xba983210]   ;;  %s2533_s27 = smov 68   ;;  %s2534_s28 = smov 64  }
   0xa   :  { %105 = vrot.lane.b32.xlu1 %v2572_v4, %s2519_s0  ;;  %64 = vrot.lane.b32.xlu0 %v2572_v4, %s2520_s14  ;;  %v2576_v5 = vld.sshfl [vmem:[#allocation1 + $0x10] sm:$0xff pattern:$0xba983210]   ;;  %v21_v6 = vld [vmem:[#allocation1] sm:$0xf]   ;;  %s2535_s29 = smov 60  }
   0xb   :  { %v31_v7 = vld [vmem:[#allocation1 + $0x8] sm:$0xf]   ;;  %27 = vst.msk [vmem:[#allocation0 + $0xfe] sm:$0x4] %vm22_vm0, %v21_v6   ;;  %23 = vst.msk [vmem:[#allocation0] sm:$0x1] %vm22_vm0, %v21_v6  }
   0xc   :  { %38 = vst.msk [vmem:[#allocation0 + $0x13e] sm:$0x4] %vm22_vm0, %v31_v7   ;;  %25 = vst.msk [vmem:[#allocation0 + $0x7f] sm:$0x2] %vm22_vm0, %v21_v6   ;;  %v42_v8 = vld [vmem:[#allocation1 + $0x10] sm:$0xf]  }
   0xd   :  { %29 = vst.msk [vmem:[#allocation0 + $0x17d] sm:$0x8] %vm22_vm0, %v21_v6   ;;  %34 = vst.msk [vmem:[#allocation0 + $0x40] sm:$0x1] %vm22_vm0, %v31_v7   ;;  %v53_v9 = vld [vmem:[#allocation1 + $0x18] sm:$0xf]  }
   0xe   :  { %36 = vst.msk [vmem:[#allocation0 + $0xbf] sm:$0x2] %vm22_vm0, %v31_v7   ;;  %40 = vst.msk [vmem:[#allocation0 + $0x1bd] sm:$0x8] %vm22_vm0, %v31_v7   ;;  %126 = vrot.lane.b32.xlu1 %v2576_v5, %s2519_s0  ;;  %85 = vrot.lane.b32.xlu0 %v2576_v5, %s2520_s14  ;;  %s2536_s30 = smov 56   ;;  %s2537_s2 = smov 52  }
   0xf   :  { %49 = vst.msk [vmem:[#allocation0 + $0x2fe] sm:$0x4] %vm22_vm0, %v42_v8   ;;  %58 = vst.msk [vmem:[#allocation0 + $0x2bf] sm:$0x2] %vm22_vm0, %v53_v9   ;;  %s2538_s3 = smov 48   ;;  %s2539_s4 = smov 44  }
  0x10   :  { %45 = vst.msk [vmem:[#allocation0 + $0x200] sm:$0x1] %vm22_vm0, %v42_v8   ;;  %47 = vst.msk [vmem:[#allocation0 + $0x27f] sm:$0x2] %vm22_vm0, %v42_v8   ;;  %s2540_s5 = smov 40   ;;  %s2541_s6 = smov 36  }
  0x11   :  { %51 = vst.msk [vmem:[#allocation0 + $0x37d] sm:$0x8] %vm22_vm0, %v42_v8   ;;  %56 = vst.msk [vmem:[#allocation0 + $0x240] sm:$0x1] %vm22_vm0, %v53_v9   ;;  %s2542_s7 = smov 32   ;;  %s2543_s8 = smov 28  }
  0x12   :  { %60 = vst.msk [vmem:[#allocation0 + $0x33e] sm:$0x4] %vm22_vm0, %v53_v9   ;;  %62 = vst.msk [vmem:[#allocation0 + $0x3bd] sm:$0x8] %vm22_vm0, %v53_v9   ;;  %167 = vrot.lane.b32.xlu1 %v2576_v5, %s2521_s15  ;;  %146 = vrot.lane.b32.xlu0 %v2572_v4, %s2521_s15  ;;  %s2544_s9 = smov 24   ;;  %s2545_s10 = smov 20  }
  0x13   :  { %s2546_s11 = smov 16   ;;  %s2547_s12 = smov 12  }
  0x14   :  { %s2548_s13 = smov 8   ;;  %s2549_s0 = smov 4  }
  0x16   :  { %208 = vrot.lane.b32.xlu1 %v2576_v5, %s2522_s16  ;;  %187 = vrot.lane.b32.xlu0 %v2572_v4, %s2522_s16 }
  0x1a   :  { %249 = vrot.lane.b32.xlu1 %v2576_v5, %s2523_s17  ;;  %228 = vrot.lane.b32.xlu0 %v2572_v4, %s2523_s17 }
  0x1e   :  { %290 = vrot.lane.b32.xlu1 %v2576_v5, %s2524_s18  ;;  %269 = vrot.lane.b32.xlu0 %v2572_v4, %s2524_s18 }
  0x22   :  { %331 = vrot.lane.b32.xlu1 %v2576_v5, %s2525_s19  ;;  %310 = vrot.lane.b32.xlu0 %v2572_v4, %s2525_s19 }
  0x26   :  { %372 = vrot.lane.b32.xlu1 %v2576_v5, %s2526_s20  ;;  %351 = vrot.lane.b32.xlu0 %v2572_v4, %s2526_s20 }
  0x2a   :  { %413 = vrot.lane.b32.xlu1 %v2576_v5, %s2527_s21  ;;  %392 = vrot.lane.b32.xlu0 %v2572_v4, %s2527_s21 }
  0x2e   :  { %454 = vrot.lane.b32.xlu1 %v2576_v5, %s2528_s22  ;;  %433 = vrot.lane.b32.xlu0 %v2572_v4, %s2528_s22 }
  0x32   :  { %495 = vrot.lane.b32.xlu1 %v2576_v5, %s2529_s23  ;;  %474 = vrot.lane.b32.xlu0 %v2572_v4, %s2529_s23 }
  0x36   :  { %536 = vrot.lane.b32.xlu1 %v2576_v5, %s2530_s24  ;;  %515 = vrot.lane.b32.xlu0 %v2572_v4, %s2530_s24 }
  0x3a   :  { %577 = vrot.lane.b32.xlu1 %v2576_v5, %s2531_s25  ;;  %556 = vrot.lane.b32.xlu0 %v2572_v4, %s2531_s25 }
  0x3e   :  { %618 = vrot.lane.b32.xlu1 %v2576_v5, %s2532_s26  ;;  %597 = vrot.lane.b32.xlu0 %v2572_v4, %s2532_s26 }
  0x42   :  { %659 = vrot.lane.b32.xlu1 %v2576_v5, %s2533_s27  ;;  %638 = vrot.lane.b32.xlu0 %v2572_v4, %s2533_s27 }
  0x46   :  { %700 = vrot.lane.b32.xlu1 %v2576_v5, %s2534_s28  ;;  %679 = vrot.lane.b32.xlu0 %v2572_v4, %s2534_s28 }
  0x4a   :  { %741 = vrot.lane.b32.xlu1 %v2576_v5, %s2535_s29  ;;  %720 = vrot.lane.b32.xlu0 %v2572_v4, %s2535_s29 }
  0x4e   :  { %782 = vrot.lane.b32.xlu1 %v2576_v5, %s2536_s30  ;;  %761 = vrot.lane.b32.xlu0 %v2572_v4, %s2536_s30 }
  0x52   :  { %823 = vrot.lane.b32.xlu1 %v2576_v5, %s2537_s2  ;;  %802 = vrot.lane.b32.xlu0 %v2572_v4, %s2537_s2 }
  0x56   :  { %864 = vrot.lane.b32.xlu1 %v2576_v5, %s2538_s3  ;;  %843 = vrot.lane.b32.xlu0 %v2572_v4, %s2538_s3 }
  0x5a   :  { %905 = vrot.lane.b32.xlu1 %v2576_v5, %s2539_s4  ;;  %884 = vrot.lane.b32.xlu0 %v2572_v4, %s2539_s4 }
  0x5e   :  { %946 = vrot.lane.b32.xlu1 %v2576_v5, %s2540_s5  ;;  %925 = vrot.lane.b32.xlu0 %v2572_v4, %s2540_s5 }
  0x62   :  { %987 = vrot.lane.b32.xlu1 %v2576_v5, %s2541_s6  ;;  %966 = vrot.lane.b32.xlu0 %v2572_v4, %s2541_s6 }
  0x66   :  { %1028 = vrot.lane.b32.xlu1 %v2576_v5, %s2542_s7  ;;  %1007 = vrot.lane.b32.xlu0 %v2572_v4, %s2542_s7 }
  0x6a   :  { %1069 = vrot.lane.b32.xlu1 %v2576_v5, %s2543_s8  ;;  %1048 = vrot.lane.b32.xlu0 %v2572_v4, %s2543_s8 }
  0x6e   :  { %1110 = vrot.lane.b32.xlu1 %v2576_v5, %s2544_s9  ;;  %1089 = vrot.lane.b32.xlu0 %v2572_v4, %s2544_s9 }
  0x72   :  { %1151 = vrot.lane.b32.xlu1 %v2576_v5, %s2545_s10  ;;  %1130 = vrot.lane.b32.xlu0 %v2572_v4, %s2545_s10 }
  0x76   :  { %1192 = vrot.lane.b32.xlu1 %v2576_v5, %s2546_s11  ;;  %1171 = vrot.lane.b32.xlu0 %v2572_v4, %s2546_s11 }
  0x7a   :  { %1233 = vrot.lane.b32.xlu1 %v2576_v5, %s2547_s12  ;;  %1212 = vrot.lane.b32.xlu0 %v2572_v4, %s2547_s12 }
  0x7c   :  { %v106_v10 = vpop.permute.xlu1 %105   ;;  %v65_v11 = vpop.permute.xlu0 %64  }
  0x7d   :  { %109 = vst.msk [vmem:[#allocation0 + $0x2] sm:$0x1] %vm22_vm0, %v106_v10   ;;  %111 = vst.msk [vmem:[#allocation0 + $0x81] sm:$0x2] %vm22_vm0, %v106_v10  }
  0x7e   :  { %113 = vst.msk [vmem:[#allocation0 + $0x100] sm:$0x4] %vm22_vm0, %v106_v10   ;;  %115 = vst.msk [vmem:[#allocation0 + $0x17f] sm:$0x8] %vm22_vm0, %v106_v10   ;;  %1274 = vrot.lane.b32.xlu1 %v2576_v5, %s2548_s13  ;;  %1253 = vrot.lane.b32.xlu0 %v2572_v4, %s2548_s13 }
  0x7f   :  { %117 = vst.msk [vmem:[#allocation0 + $0x3e] sm:$0x10] %vm22_vm0, %v106_v10   ;;  %119 = vst.msk [vmem:[#allocation0 + $0xbd] sm:$0x20] %vm22_vm0, %v106_v10  }
  0x80   :  { %121 = vst.msk [vmem:[#allocation0 + $0x13c] sm:$0x40] %vm22_vm0, %v106_v10   ;;  %123 = vst.msk [vmem:[#allocation0 + $0x1bb] sm:$0x80] %vm22_vm0, %v106_v10   ;;  %v127_v12 = vpop.permute.xlu1 %126   ;;  %v86_v13 = vpop.permute.xlu0 %85  }
  0x81   :  { %68 = vst.msk [vmem:[#allocation0 + $0x1] sm:$0x1] %vm22_vm0, %v65_v11   ;;  %70 = vst.msk [vmem:[#allocation0 + $0x80] sm:$0x2] %vm22_vm0, %v65_v11  }
  0x82   :  { %72 = vst.msk [vmem:[#allocation0 + $0xff] sm:$0x4] %vm22_vm0, %v65_v11   ;;  %74 = vst.msk [vmem:[#allocation0 + $0x17e] sm:$0x8] %vm22_vm0, %v65_v11   ;;  %1315 = vrot.lane.b32.xlu1 %v2576_v5, %s2549_s0  ;;  %1294 = vrot.lane.b32.xlu0 %v2572_v4, %s2549_s0 }
  0x83   :  { %76 = vst.msk [vmem:[#allocation0 + $0x3d] sm:$0x10] %vm22_vm0, %v65_v11   ;;  %78 = vst.msk [vmem:[#allocation0 + $0xbc] sm:$0x20] %vm22_vm0, %v65_v11  }
  0x84   :  { %80 = vst.msk [vmem:[#allocation0 + $0x13b] sm:$0x40] %vm22_vm0, %v65_v11   ;;  %82 = vst.msk [vmem:[#allocation0 + $0x1ba] sm:$0x80] %vm22_vm0, %v65_v11   ;;  %v168_v14 = vpop.permute.xlu1 %167   ;;  %v147_v15 = vpop.permute.xlu0 %146  }
  0x85   :  { %130 = vst.msk [vmem:[#allocation0 + $0x202] sm:$0x1] %vm22_vm0, %v127_v12   ;;  %132 = vst.msk [vmem:[#allocation0 + $0x281] sm:$0x2] %vm22_vm0, %v127_v12  }
  0x86   :  { %134 = vst.msk [vmem:[#allocation0 + $0x300] sm:$0x4] %vm22_vm0, %v127_v12   ;;  %136 = vst.msk [vmem:[#allocation0 + $0x37f] sm:$0x8] %vm22_vm0, %v127_v12  }
  0x87   :  { %138 = vst.msk [vmem:[#allocation0 + $0x23e] sm:$0x10] %vm22_vm0, %v127_v12   ;;  %140 = vst.msk [vmem:[#allocation0 + $0x2bd] sm:$0x20] %vm22_vm0, %v127_v12  }
  0x88   :  { %142 = vst.msk [vmem:[#allocation0 + $0x33c] sm:$0x40] %vm22_vm0, %v127_v12   ;;  %144 = vst.msk [vmem:[#allocation0 + $0x3bb] sm:$0x80] %vm22_vm0, %v127_v12   ;;  %v209_v16 = vpop.permute.xlu1 %208   ;;  %v188_v17 = vpop.permute.xlu0 %187  }
  0x89   :  { %89 = vst.msk [vmem:[#allocation0 + $0x201] sm:$0x1] %vm22_vm0, %v86_v13   ;;  %91 = vst.msk [vmem:[#allocation0 + $0x280] sm:$0x2] %vm22_vm0, %v86_v13  }
  0x8a   :  { %93 = vst.msk [vmem:[#allocation0 + $0x2ff] sm:$0x4] %vm22_vm0, %v86_v13   ;;  %95 = vst.msk [vmem:[#allocation0 + $0x37e] sm:$0x8] %vm22_vm0, %v86_v13  }
  0x8b   :  { %97 = vst.msk [vmem:[#allocation0 + $0x23d] sm:$0x10] %vm22_vm0, %v86_v13   ;;  %99 = vst.msk [vmem:[#allocation0 + $0x2bc] sm:$0x20] %vm22_vm0, %v86_v13  }
  0x8c   :  { %101 = vst.msk [vmem:[#allocation0 + $0x33b] sm:$0x40] %vm22_vm0, %v86_v13   ;;  %103 = vst.msk [vmem:[#allocation0 + $0x3ba] sm:$0x80] %vm22_vm0, %v86_v13   ;;  %v250_v21 = vpop.permute.xlu1 %249   ;;  %v229_v22 = vpop.permute.xlu0 %228  }
  0x8d   :  { %171 = vst.msk [vmem:[#allocation0 + $0x203] sm:$0x1] %vm22_vm0, %v168_v14   ;;  %173 = vst.msk [vmem:[#allocation0 + $0x282] sm:$0x2] %vm22_vm0, %v168_v14  }
  0x8e   :  { %175 = vst.msk [vmem:[#allocation0 + $0x301] sm:$0x4] %vm22_vm0, %v168_v14   ;;  %177 = vst.msk [vmem:[#allocation0 + $0x380] sm:$0x8] %vm22_vm0, %v168_v14  }
  0x8f   :  { %179 = vst.msk [vmem:[#allocation0 + $0x23f] sm:$0x10] %vm22_vm0, %v168_v14   ;;  %181 = vst.msk [vmem:[#allocation0 + $0x2be] sm:$0x20] %vm22_vm0, %v168_v14  }
  0x90   :  { %183 = vst.msk [vmem:[#allocation0 + $0x33d] sm:$0x40] %vm22_vm0, %v168_v14   ;;  %185 = vst.msk [vmem:[#allocation0 + $0x3bc] sm:$0x80] %vm22_vm0, %v168_v14   ;;  %v291_v35 = vpop.permute.xlu1 %290   ;;  %v270_v36 = vpop.permute.xlu0 %269  }
  0x91   :  { %150 = vst.msk [vmem:[#allocation0 + $0x3] sm:$0x1] %vm22_vm0, %v147_v15   ;;  %152 = vst.msk [vmem:[#allocation0 + $0x82] sm:$0x2] %vm22_vm0, %v147_v15  }
  0x92   :  { %154 = vst.msk [vmem:[#allocation0 + $0x101] sm:$0x4] %vm22_vm0, %v147_v15   ;;  %156 = vst.msk [vmem:[#allocation0 + $0x180] sm:$0x8] %vm22_vm0, %v147_v15  }
  0x93   :  { %158 = vst.msk [vmem:[#allocation0 + $0x3f] sm:$0x10] %vm22_vm0, %v147_v15   ;;  %160 = vst.msk [vmem:[#allocation0 + $0xbe] sm:$0x20] %vm22_vm0, %v147_v15  }
  0x94   :  { %162 = vst.msk [vmem:[#allocation0 + $0x13d] sm:$0x40] %vm22_vm0, %v147_v15   ;;  %164 = vst.msk [vmem:[#allocation0 + $0x1bc] sm:$0x80] %vm22_vm0, %v147_v15   ;;  %v1783_v18 = vld [vmem:[#allocation0 + $0x200] sm:$0xf]  ;;  %v332_v38 = vpop.permute.xlu1 %331   ;;  %v311_v39 = vpop.permute.xlu0 %310  }
  0x95   :  { %212 = vst.msk [vmem:[#allocation0 + $0x208] sm:$0x1] %vm22_vm0, %v209_v16   ;;  %214 = vst.msk [vmem:[#allocation0 + $0x287] sm:$0x2] %vm22_vm0, %v209_v16   ;;  %v1895_v20 = vld [vmem:[#allocation0 + $0x280] sm:$0xf] }
  0x96   :  { %216 = vst.msk [vmem:[#allocation0 + $0x306] sm:$0x4] %vm22_vm0, %v209_v16   ;;  %218 = vst.msk [vmem:[#allocation0 + $0x385] sm:$0x8] %vm22_vm0, %v209_v16   ;;  %v1839_v19 = vld [vmem:[#allocation0 + $0x240] sm:$0xf] }
  0x97   :  { %220 = vst.msk [vmem:[#allocation0 + $0x244] sm:$0x10] %vm22_vm0, %v209_v16   ;;  %222 = vst.msk [vmem:[#allocation0 + $0x2c3] sm:$0x20] %vm22_vm0, %v209_v16   ;;  %v2063_v23 = vld [vmem:[#allocation0 + $0x340] sm:$0xf] }
  0x98   :  { %224 = vst.msk [vmem:[#allocation0 + $0x342] sm:$0x40] %vm22_vm0, %v209_v16   ;;  %226 = vst.msk [vmem:[#allocation0 + $0x3c1] sm:$0x80] %vm22_vm0, %v209_v16   ;;  %v2119_v24 = vld [vmem:[#allocation0 + $0x380] sm:$0xf]  ;;  %v373_v40 = vpop.permute.xlu1 %372   ;;  %v352_v41 = vpop.permute.xlu0 %351  }
  0x99   :  { %191 = vst.msk [vmem:[#allocation0 + $0x8] sm:$0x1] %vm22_vm0, %v188_v17   ;;  %193 = vst.msk [vmem:[#allocation0 + $0x87] sm:$0x2] %vm22_vm0, %v188_v17   ;;  %v1951_v25 = vld [vmem:[#allocation0 + $0x2c0] sm:$0xf] }
  0x9a   :  { %195 = vst.msk [vmem:[#allocation0 + $0x106] sm:$0x4] %vm22_vm0, %v188_v17   ;;  %197 = vst.msk [vmem:[#allocation0 + $0x185] sm:$0x8] %vm22_vm0, %v188_v17   ;;  %v2007_v26 = vld [vmem:[#allocation0 + $0x300] sm:$0xf] }
  0x9b   :  { %199 = vst.msk [vmem:[#allocation0 + $0x44] sm:$0x10] %vm22_vm0, %v188_v17   ;;  %201 = vst.msk [vmem:[#allocation0 + $0xc3] sm:$0x20] %vm22_vm0, %v188_v17   ;;  %v2175_v27 = vld [vmem:[#allocation0 + $0x3c0] sm:$0xf] }
  0x9c   :  { %203 = vst.msk [vmem:[#allocation0 + $0x142] sm:$0x40] %vm22_vm0, %v188_v17   ;;  %205 = vst.msk [vmem:[#allocation0 + $0x1c1] sm:$0x80] %vm22_vm0, %v188_v17   ;;  %v1338_v28 = vld [vmem:[#allocation0] sm:$0xf]  ;;  %v414_v45 = vpop.permute.xlu1 %413   ;;  %v393_v46 = vpop.permute.xlu0 %392  }
  0x9d   :  { %2424 = vst [vmem:[%s3535_s1 + $0x100] sm:$0xf] %v1783_v18  ;;  %2432 = vst [vmem:[%s3535_s1 + $0x120] sm:$0xf] %v1839_v19  ;;  %v1671_v29 = vld [vmem:[#allocation0 + $0x180] sm:$0xf] }
  0x9e   :  { %2440 = vst [vmem:[%s3535_s1 + $0x140] sm:$0xf] %v1895_v20  ;;  %253 = vst.msk [vmem:[#allocation0 + $0x209] sm:$0x1] %vm22_vm0, %v250_v21   ;;  %v1391_v30 = vld [vmem:[#allocation0 + $0x40] sm:$0xf] }
  0x9f   :  { %255 = vst.msk [vmem:[#allocation0 + $0x288] sm:$0x2] %vm22_vm0, %v250_v21   ;;  %257 = vst.msk [vmem:[#allocation0 + $0x307] sm:$0x4] %vm22_vm0, %v250_v21   ;;  %v1447_v31 = vld [vmem:[#allocation0 + $0x80] sm:$0xf] }
  0xa0   :  { %259 = vst.msk [vmem:[#allocation0 + $0x386] sm:$0x8] %vm22_vm0, %v250_v21   ;;  %261 = vst.msk [vmem:[#allocation0 + $0x245] sm:$0x10] %vm22_vm0, %v250_v21   ;;  %v1503_v32 = vld [vmem:[#allocation0 + $0xc0] sm:$0xf]  ;;  %v455_v59 = vpop.permute.xlu1 %454   ;;  %v434_v60 = vpop.permute.xlu0 %433  }
  0xa1   :  { %263 = vst.msk [vmem:[#allocation0 + $0x2c4] sm:$0x20] %vm22_vm0, %v250_v21   ;;  %265 = vst.msk [vmem:[#allocation0 + $0x343] sm:$0x40] %vm22_vm0, %v250_v21   ;;  %v1559_v33 = vld [vmem:[#allocation0 + $0x100] sm:$0xf] }
  0xa2   :  { %267 = vst.msk [vmem:[#allocation0 + $0x3c2] sm:$0x80] %vm22_vm0, %v250_v21   ;;  %232 = vst.msk [vmem:[#allocation0 + $0x9] sm:$0x1] %vm22_vm0, %v229_v22   ;;  %v1615_v34 = vld [vmem:[#allocation0 + $0x140] sm:$0xf] }
  0xa3   :  { %234 = vst.msk [vmem:[#allocation0 + $0x88] sm:$0x2] %vm22_vm0, %v229_v22   ;;  %236 = vst.msk [vmem:[#allocation0 + $0x107] sm:$0x4] %vm22_vm0, %v229_v22   ;;  %v1727_v37 = vld [vmem:[#allocation0 + $0x1c0] sm:$0xf] }
  0xa4   :  { %238 = vst.msk [vmem:[#allocation0 + $0x186] sm:$0x8] %vm22_vm0, %v229_v22   ;;  %240 = vst.msk [vmem:[#allocation0 + $0x45] sm:$0x10] %vm22_vm0, %v229_v22   ;;  %v496_v62 = vpop.permute.xlu1 %495   ;;  %v475_v63 = vpop.permute.xlu0 %474  }
  0xa5   :  { %242 = vst.msk [vmem:[#allocation0 + $0xc4] sm:$0x20] %vm22_vm0, %v229_v22   ;;  %244 = vst.msk [vmem:[#allocation0 + $0x143] sm:$0x40] %vm22_vm0, %v229_v22  }
  0xa6   :  { %246 = vst.msk [vmem:[#allocation0 + $0x1c2] sm:$0x80] %vm22_vm0, %v229_v22   ;;  %2464 = vst [vmem:[%s3535_s1 + $0x1a0] sm:$0xf] %v2063_v23 }
  0xa7   :  { %2472 = vst [vmem:[%s3535_s1 + $0x1c0] sm:$0xf] %v2119_v24  ;;  %2448 = vst [vmem:[%s3535_s1 + $0x160] sm:$0xf] %v1951_v25 }
  0xa8   :  { %1341 = vst [vmem:[%s3535_s1] sm:$0xf] %v1338_v28  ;;  %2456 = vst [vmem:[%s3535_s1 + $0x180] sm:$0xf] %v2007_v26  ;;  %v537_v0 = vpop.permute.xlu1 %536   ;;  %v516_v1 = vpop.permute.xlu0 %515  }
  0xa9   :  { %2480 = vst [vmem:[%s3535_s1 + $0x1e0] sm:$0xf] %v2175_v27  ;;  %2408 = vst [vmem:[%s3535_s1 + $0xc0] sm:$0xf] %v1671_v29 }
  0xaa   :  { %2368 = vst [vmem:[%s3535_s1 + $0x20] sm:$0xf] %v1391_v30  ;;  %2376 = vst [vmem:[%s3535_s1 + $0x40] sm:$0xf] %v1447_v31 }
  0xab   :  { %2384 = vst [vmem:[%s3535_s1 + $0x60] sm:$0xf] %v1503_v32  ;;  %2392 = vst [vmem:[%s3535_s1 + $0x80] sm:$0xf] %v1559_v33 }
  0xac   :  { %2400 = vst [vmem:[%s3535_s1 + $0xa0] sm:$0xf] %v1615_v34  ;;  %294 = vst.msk [vmem:[#allocation0 + $0x20a] sm:$0x1] %vm22_vm0, %v291_v35   ;;  %v578_v5 = vpop.permute.xlu1 %577   ;;  %v557_v6 = vpop.permute.xlu0 %556  }
  0xad   :  { %296 = vst.msk [vmem:[#allocation0 + $0x289] sm:$0x2] %vm22_vm0, %v291_v35   ;;  %298 = vst.msk [vmem:[#allocation0 + $0x308] sm:$0x4] %vm22_vm0, %v291_v35  }
  0xae   :  { %300 = vst.msk [vmem:[#allocation0 + $0x387] sm:$0x8] %vm22_vm0, %v291_v35   ;;  %302 = vst.msk [vmem:[#allocation0 + $0x246] sm:$0x10] %vm22_vm0, %v291_v35  }
  0xaf   :  { %304 = vst.msk [vmem:[#allocation0 + $0x2c5] sm:$0x20] %vm22_vm0, %v291_v35   ;;  %306 = vst.msk [vmem:[#allocation0 + $0x344] sm:$0x40] %vm22_vm0, %v291_v35  }
  0xb0   :  { %308 = vst.msk [vmem:[#allocation0 + $0x3c3] sm:$0x80] %vm22_vm0, %v291_v35   ;;  %273 = vst.msk [vmem:[#allocation0 + $0xa] sm:$0x1] %vm22_vm0, %v270_v36   ;;  %v619_v19 = vpop.permute.xlu1 %618   ;;  %v598_v20 = vpop.permute.xlu0 %597  }
  0xb1   :  { %275 = vst.msk [vmem:[#allocation0 + $0x89] sm:$0x2] %vm22_vm0, %v270_v36   ;;  %277 = vst.msk [vmem:[#allocation0 + $0x108] sm:$0x4] %vm22_vm0, %v270_v36  }
  0xb2   :  { %279 = vst.msk [vmem:[#allocation0 + $0x187] sm:$0x8] %vm22_vm0, %v270_v36   ;;  %281 = vst.msk [vmem:[#allocation0 + $0x46] sm:$0x10] %vm22_vm0, %v270_v36  }
  0xb3   :  { %283 = vst.msk [vmem:[#allocation0 + $0xc5] sm:$0x20] %vm22_vm0, %v270_v36   ;;  %285 = vst.msk [vmem:[#allocation0 + $0x144] sm:$0x40] %vm22_vm0, %v270_v36  }
  0xb4   :  { %287 = vst.msk [vmem:[#allocation0 + $0x1c3] sm:$0x80] %vm22_vm0, %v270_v36   ;;  %2416 = vst [vmem:[%s3535_s1 + $0xe0] sm:$0xf] %v1727_v37  ;;  %v660_v22 = vpop.permute.xlu1 %659   ;;  %v639_v23 = vpop.permute.xlu0 %638  }
  0xb5   :  { %335 = vst.msk [vmem:[#allocation0 + $0x20b] sm:$0x1] %vm22_vm0, %v332_v38   ;;  %337 = vst.msk [vmem:[#allocation0 + $0x28a] sm:$0x2] %vm22_vm0, %v332_v38  }
  0xb6   :  { %339 = vst.msk [vmem:[#allocation0 + $0x309] sm:$0x4] %vm22_vm0, %v332_v38   ;;  %341 = vst.msk [vmem:[#allocation0 + $0x388] sm:$0x8] %vm22_vm0, %v332_v38  }
  0xb7   :  { %343 = vst.msk [vmem:[#allocation0 + $0x247] sm:$0x10] %vm22_vm0, %v332_v38   ;;  %345 = vst.msk [vmem:[#allocation0 + $0x2c6] sm:$0x20] %vm22_vm0, %v332_v38  }
  0xb8   :  { %347 = vst.msk [vmem:[#allocation0 + $0x345] sm:$0x40] %vm22_vm0, %v332_v38   ;;  %349 = vst.msk [vmem:[#allocation0 + $0x3c4] sm:$0x80] %vm22_vm0, %v332_v38   ;;  %v701_v24 = vpop.permute.xlu1 %700   ;;  %v680_v25 = vpop.permute.xlu0 %679  }
  0xb9   :  { %314 = vst.msk [vmem:[#allocation0 + $0xb] sm:$0x1] %vm22_vm0, %v311_v39   ;;  %316 = vst.msk [vmem:[#allocation0 + $0x8a] sm:$0x2] %vm22_vm0, %v311_v39  }
  0xba   :  { %318 = vst.msk [vmem:[#allocation0 + $0x109] sm:$0x4] %vm22_vm0, %v311_v39   ;;  %320 = vst.msk [vmem:[#allocation0 + $0x188] sm:$0x8] %vm22_vm0, %v311_v39  }
  0xbb   :  { %322 = vst.msk [vmem:[#allocation0 + $0x47] sm:$0x10] %vm22_vm0, %v311_v39   ;;  %324 = vst.msk [vmem:[#allocation0 + $0xc6] sm:$0x20] %vm22_vm0, %v311_v39  }
  0xbc   :  { %326 = vst.msk [vmem:[#allocation0 + $0x145] sm:$0x40] %vm22_vm0, %v311_v39   ;;  %328 = vst.msk [vmem:[#allocation0 + $0x1c4] sm:$0x80] %vm22_vm0, %v311_v39   ;;  %v1790_v43 = vld [vmem:[#allocation0 + $0x208] sm:$0xf]  ;;  %v742_v29 = vpop.permute.xlu1 %741   ;;  %v721_v30 = vpop.permute.xlu0 %720  }
  0xbd   :  { %376 = vst.msk [vmem:[#allocation0 + $0x210] sm:$0x1] %vm22_vm0, %v373_v40   ;;  %378 = vst.msk [vmem:[#allocation0 + $0x28f] sm:$0x2] %vm22_vm0, %v373_v40   ;;  %v1902_v44 = vld [vmem:[#allocation0 + $0x288] sm:$0xf] }
  0xbe   :  { %380 = vst.msk [vmem:[#allocation0 + $0x30e] sm:$0x4] %vm22_vm0, %v373_v40   ;;  %382 = vst.msk [vmem:[#allocation0 + $0x38d] sm:$0x8] %vm22_vm0, %v373_v40   ;;  %v1846_v42 = vld [vmem:[#allocation0 + $0x248] sm:$0xf] }
  0xbf   :  { %384 = vst.msk [vmem:[#allocation0 + $0x24c] sm:$0x10] %vm22_vm0, %v373_v40   ;;  %386 = vst.msk [vmem:[#allocation0 + $0x2cb] sm:$0x20] %vm22_vm0, %v373_v40   ;;  %v1958_v47 = vld [vmem:[#allocation0 + $0x2c8] sm:$0xf] }
  0xc0   :  { %388 = vst.msk [vmem:[#allocation0 + $0x34a] sm:$0x40] %vm22_vm0, %v373_v40   ;;  %390 = vst.msk [vmem:[#allocation0 + $0x3c9] sm:$0x80] %vm22_vm0, %v373_v40   ;;  %v2014_v48 = vld [vmem:[#allocation0 + $0x308] sm:$0xf] }
  0xc1   :  { %355 = vst.msk [vmem:[#allocation0 + $0x10] sm:$0x1] %vm22_vm0, %v352_v41   ;;  %357 = vst.msk [vmem:[#allocation0 + $0x8f] sm:$0x2] %vm22_vm0, %v352_v41   ;;  %v2070_v49 = vld [vmem:[#allocation0 + $0x348] sm:$0xf] }
  0xc2   :  { %359 = vst.msk [vmem:[#allocation0 + $0x10e] sm:$0x4] %vm22_vm0, %v352_v41   ;;  %361 = vst.msk [vmem:[#allocation0 + $0x18d] sm:$0x8] %vm22_vm0, %v352_v41   ;;  %v2126_v50 = vld [vmem:[#allocation0 + $0x388] sm:$0xf] }
  0xc3   :  { %363 = vst.msk [vmem:[#allocation0 + $0x4c] sm:$0x10] %vm22_vm0, %v352_v41   ;;  %365 = vst.msk [vmem:[#allocation0 + $0xcb] sm:$0x20] %vm22_vm0, %v352_v41   ;;  %v2182_v51 = vld [vmem:[#allocation0 + $0x3c8] sm:$0xf] }
  0xc4   :  { %367 = vst.msk [vmem:[#allocation0 + $0x14a] sm:$0x40] %vm22_vm0, %v352_v41   ;;  %369 = vst.msk [vmem:[#allocation0 + $0x1c9] sm:$0x80] %vm22_vm0, %v352_v41   ;;  %v1343_v52 = vld [vmem:[#allocation0 + $0x8] sm:$0xf] }
  0xc5   :  { %2433 = vst [vmem:[%s3535_s1 + $0x124] sm:$0xf] %v1846_v42  ;;  %2425 = vst [vmem:[%s3535_s1 + $0x104] sm:$0xf] %v1790_v43  ;;  %v1398_v53 = vld [vmem:[#allocation0 + $0x48] sm:$0xf]  ;;  %v783_v43 = vpop.permute.xlu1 %782  }
  0xc6   :  { %2441 = vst [vmem:[%s3535_s1 + $0x144] sm:$0xf] %v1902_v44  ;;  %417 = vst.msk [vmem:[#allocation0 + $0x211] sm:$0x1] %vm22_vm0, %v414_v45   ;;  %v1454_v54 = vld [vmem:[#allocation0 + $0x88] sm:$0xf]  ;;  %v762_v44 = vpop.permute.xlu0 %761  }
  0xc7   :  { %419 = vst.msk [vmem:[#allocation0 + $0x290] sm:$0x2] %vm22_vm0, %v414_v45   ;;  %421 = vst.msk [vmem:[#allocation0 + $0x30f] sm:$0x4] %vm22_vm0, %v414_v45   ;;  %v1510_v55 = vld [vmem:[#allocation0 + $0xc8] sm:$0xf] }
  0xc8   :  { %423 = vst.msk [vmem:[#allocation0 + $0x38e] sm:$0x8] %vm22_vm0, %v414_v45   ;;  %425 = vst.msk [vmem:[#allocation0 + $0x24d] sm:$0x10] %vm22_vm0, %v414_v45   ;;  %v1566_v56 = vld [vmem:[#allocation0 + $0x108] sm:$0xf] }
  0xc9   :  { %427 = vst.msk [vmem:[#allocation0 + $0x2cc] sm:$0x20] %vm22_vm0, %v414_v45   ;;  %429 = vst.msk [vmem:[#allocation0 + $0x34b] sm:$0x40] %vm22_vm0, %v414_v45   ;;  %v1622_v57 = vld [vmem:[#allocation0 + $0x148] sm:$0xf] }
  0xca   :  { %431 = vst.msk [vmem:[#allocation0 + $0x3ca] sm:$0x80] %vm22_vm0, %v414_v45   ;;  %396 = vst.msk [vmem:[#allocation0 + $0x11] sm:$0x1] %vm22_vm0, %v393_v46   ;;  %v1678_v58 = vld [vmem:[#allocation0 + $0x188] sm:$0xf] }
  0xcb   :  { %398 = vst.msk [vmem:[#allocation0 + $0x90] sm:$0x2] %vm22_vm0, %v393_v46   ;;  %400 = vst.msk [vmem:[#allocation0 + $0x10f] sm:$0x4] %vm22_vm0, %v393_v46   ;;  %v1734_v61 = vld [vmem:[#allocation0 + $0x1c8] sm:$0xf] }
  0xcc   :  { %402 = vst.msk [vmem:[#allocation0 + $0x18e] sm:$0x8] %vm22_vm0, %v393_v46   ;;  %404 = vst.msk [vmem:[#allocation0 + $0x4d] sm:$0x10] %vm22_vm0, %v393_v46  }
  0xcd   :  { %406 = vst.msk [vmem:[#allocation0 + $0xcc] sm:$0x20] %vm22_vm0, %v393_v46   ;;  %408 = vst.msk [vmem:[#allocation0 + $0x14b] sm:$0x40] %vm22_vm0, %v393_v46  }
  0xce   :  { %410 = vst.msk [vmem:[#allocation0 + $0x1ca] sm:$0x80] %vm22_vm0, %v393_v46   ;;  %2449 = vst [vmem:[%s3535_s1 + $0x164] sm:$0xf] %v1958_v47  ;;  %v824_v46 = vpop.permute.xlu1 %823   ;;  %v803_v47 = vpop.permute.xlu0 %802  }
  0xcf   :  { %2457 = vst [vmem:[%s3535_s1 + $0x184] sm:$0xf] %v2014_v48  ;;  %2465 = vst [vmem:[%s3535_s1 + $0x1a4] sm:$0xf] %v2070_v49 }
  0xd0   :  { %2473 = vst [vmem:[%s3535_s1 + $0x1c4] sm:$0xf] %v2126_v50  ;;  %2481 = vst [vmem:[%s3535_s1 + $0x1e4] sm:$0xf] %v2182_v51 }
  0xd1   :  { %2361 = vst [vmem:[%s3535_s1 + $0x4] sm:$0xf] %v1343_v52  ;;  %2369 = vst [vmem:[%s3535_s1 + $0x24] sm:$0xf] %v1398_v53 }
  0xd2   :  { %2377 = vst [vmem:[%s3535_s1 + $0x44] sm:$0xf] %v1454_v54  ;;  %2385 = vst [vmem:[%s3535_s1 + $0x64] sm:$0xf] %v1510_v55  ;;  %v865_v48 = vpop.permute.xlu1 %864   ;;  %v844_v49 = vpop.permute.xlu0 %843  }
  0xd3   :  { %2393 = vst [vmem:[%s3535_s1 + $0x84] sm:$0xf] %v1566_v56  ;;  %2401 = vst [vmem:[%s3535_s1 + $0xa4] sm:$0xf] %v1622_v57 }
  0xd4   :  { %2409 = vst [vmem:[%s3535_s1 + $0xc4] sm:$0xf] %v1678_v58  ;;  %458 = vst.msk [vmem:[#allocation0 + $0x212] sm:$0x1] %vm22_vm0, %v455_v59  }
  0xd5   :  { %460 = vst.msk [vmem:[#allocation0 + $0x291] sm:$0x2] %vm22_vm0, %v455_v59   ;;  %462 = vst.msk [vmem:[#allocation0 + $0x310] sm:$0x4] %vm22_vm0, %v455_v59  }
  0xd6   :  { %464 = vst.msk [vmem:[#allocation0 + $0x38f] sm:$0x8] %vm22_vm0, %v455_v59   ;;  %466 = vst.msk [vmem:[#allocation0 + $0x24e] sm:$0x10] %vm22_vm0, %v455_v59   ;;  %v906_v53 = vpop.permute.xlu1 %905   ;;  %v885_v54 = vpop.permute.xlu0 %884  }
  0xd7   :  { %468 = vst.msk [vmem:[#allocation0 + $0x2cd] sm:$0x20] %vm22_vm0, %v455_v59   ;;  %470 = vst.msk [vmem:[#allocation0 + $0x34c] sm:$0x40] %vm22_vm0, %v455_v59  }
  0xd8   :  { %472 = vst.msk [vmem:[#allocation0 + $0x3cb] sm:$0x80] %vm22_vm0, %v455_v59   ;;  %437 = vst.msk [vmem:[#allocation0 + $0x12] sm:$0x1] %vm22_vm0, %v434_v60  }
  0xd9   :  { %439 = vst.msk [vmem:[#allocation0 + $0x91] sm:$0x2] %vm22_vm0, %v434_v60   ;;  %441 = vst.msk [vmem:[#allocation0 + $0x110] sm:$0x4] %vm22_vm0, %v434_v60  }
  0xda   :  { %443 = vst.msk [vmem:[#allocation0 + $0x18f] sm:$0x8] %vm22_vm0, %v434_v60   ;;  %445 = vst.msk [vmem:[#allocation0 + $0x4e] sm:$0x10] %vm22_vm0, %v434_v60  }
  0xdb   :  { %447 = vst.msk [vmem:[#allocation0 + $0xcd] sm:$0x20] %vm22_vm0, %v434_v60   ;;  %449 = vst.msk [vmem:[#allocation0 + $0x14c] sm:$0x40] %vm22_vm0, %v434_v60  }
  0xdc   :  { %451 = vst.msk [vmem:[#allocation0 + $0x1cb] sm:$0x80] %vm22_vm0, %v434_v60   ;;  %2417 = vst [vmem:[%s3535_s1 + $0xe4] sm:$0xf] %v1734_v61 }
  0xdd   :  { %499 = vst.msk [vmem:[#allocation0 + $0x213] sm:$0x1] %vm22_vm0, %v496_v62   ;;  %501 = vst.msk [vmem:[#allocation0 + $0x292] sm:$0x2] %vm22_vm0, %v496_v62  }
  0xde   :  { %503 = vst.msk [vmem:[#allocation0 + $0x311] sm:$0x4] %vm22_vm0, %v496_v62   ;;  %505 = vst.msk [vmem:[#allocation0 + $0x390] sm:$0x8] %vm22_vm0, %v496_v62  }
  0xdf   :  { %507 = vst.msk [vmem:[#allocation0 + $0x24f] sm:$0x10] %vm22_vm0, %v496_v62   ;;  %509 = vst.msk [vmem:[#allocation0 + $0x2ce] sm:$0x20] %vm22_vm0, %v496_v62  }
  0xe0   :  { %511 = vst.msk [vmem:[#allocation0 + $0x34d] sm:$0x40] %vm22_vm0, %v496_v62   ;;  %513 = vst.msk [vmem:[#allocation0 + $0x3cc] sm:$0x80] %vm22_vm0, %v496_v62  }
  0xe1   :  { %478 = vst.msk [vmem:[#allocation0 + $0x13] sm:$0x1] %vm22_vm0, %v475_v63   ;;  %480 = vst.msk [vmem:[#allocation0 + $0x92] sm:$0x2] %vm22_vm0, %v475_v63  }
  0xe2   :  { %482 = vst.msk [vmem:[#allocation0 + $0x111] sm:$0x4] %vm22_vm0, %v475_v63   ;;  %484 = vst.msk [vmem:[#allocation0 + $0x190] sm:$0x8] %vm22_vm0, %v475_v63  }
  0xe3   :  { %486 = vst.msk [vmem:[#allocation0 + $0x4f] sm:$0x10] %vm22_vm0, %v475_v63   ;;  %488 = vst.msk [vmem:[#allocation0 + $0xce] sm:$0x20] %vm22_vm0, %v475_v63  }
  0xe4   :  { %490 = vst.msk [vmem:[#allocation0 + $0x14d] sm:$0x40] %vm22_vm0, %v475_v63   ;;  %492 = vst.msk [vmem:[#allocation0 + $0x1cc] sm:$0x80] %vm22_vm0, %v475_v63   ;;  %v1797_v2 = vld [vmem:[#allocation0 + $0x210] sm:$0xf] }
  0xe5   :  { %540 = vst.msk [vmem:[#allocation0 + $0x218] sm:$0x1] %vm22_vm0, %v537_v0   ;;  %542 = vst.msk [vmem:[#allocation0 + $0x297] sm:$0x2] %vm22_vm0, %v537_v0   ;;  %v1909_v4 = vld [vmem:[#allocation0 + $0x290] sm:$0xf] }
  0xe6   :  { %544 = vst.msk [vmem:[#allocation0 + $0x316] sm:$0x4] %vm22_vm0, %v537_v0   ;;  %546 = vst.msk [vmem:[#allocation0 + $0x395] sm:$0x8] %vm22_vm0, %v537_v0   ;;  %v1853_v3 = vld [vmem:[#allocation0 + $0x250] sm:$0xf] }
  0xe7   :  { %548 = vst.msk [vmem:[#allocation0 + $0x254] sm:$0x10] %vm22_vm0, %v537_v0   ;;  %550 = vst.msk [vmem:[#allocation0 + $0x2d3] sm:$0x20] %vm22_vm0, %v537_v0   ;;  %v1965_v7 = vld [vmem:[#allocation0 + $0x2d0] sm:$0xf] }
  0xe8   :  { %552 = vst.msk [vmem:[#allocation0 + $0x352] sm:$0x40] %vm22_vm0, %v537_v0   ;;  %554 = vst.msk [vmem:[#allocation0 + $0x3d1] sm:$0x80] %vm22_vm0, %v537_v0   ;;  %v2021_v8 = vld [vmem:[#allocation0 + $0x310] sm:$0xf] }
  0xe9   :  { %519 = vst.msk [vmem:[#allocation0 + $0x18] sm:$0x1] %vm22_vm0, %v516_v1   ;;  %521 = vst.msk [vmem:[#allocation0 + $0x97] sm:$0x2] %vm22_vm0, %v516_v1   ;;  %v2077_v9 = vld [vmem:[#allocation0 + $0x350] sm:$0xf] }
  0xea   :  { %523 = vst.msk [vmem:[#allocation0 + $0x116] sm:$0x4] %vm22_vm0, %v516_v1   ;;  %525 = vst.msk [vmem:[#allocation0 + $0x195] sm:$0x8] %vm22_vm0, %v516_v1   ;;  %v2133_v10 = vld [vmem:[#allocation0 + $0x390] sm:$0xf] }
  0xeb   :  { %527 = vst.msk [vmem:[#allocation0 + $0x54] sm:$0x10] %vm22_vm0, %v516_v1   ;;  %529 = vst.msk [vmem:[#allocation0 + $0xd3] sm:$0x20] %vm22_vm0, %v516_v1   ;;  %v2189_v11 = vld [vmem:[#allocation0 + $0x3d0] sm:$0xf] }
  0xec   :  { %531 = vst.msk [vmem:[#allocation0 + $0x152] sm:$0x40] %vm22_vm0, %v516_v1   ;;  %533 = vst.msk [vmem:[#allocation0 + $0x1d1] sm:$0x80] %vm22_vm0, %v516_v1   ;;  %v1349_v12 = vld [vmem:[#allocation0 + $0x10] sm:$0xf] }
  0xed   :  { %2426 = vst [vmem:[%s3535_s1 + $0x108] sm:$0xf] %v1797_v2  ;;  %2434 = vst [vmem:[%s3535_s1 + $0x128] sm:$0xf] %v1853_v3  ;;  %v1405_v13 = vld [vmem:[#allocation0 + $0x50] sm:$0xf]  ;;  %v947_v3 = vpop.permute.xlu1 %946  }
  0xee   :  { %2442 = vst [vmem:[%s3535_s1 + $0x148] sm:$0xf] %v1909_v4  ;;  %581 = vst.msk [vmem:[#allocation0 + $0x219] sm:$0x1] %vm22_vm0, %v578_v5   ;;  %v1461_v14 = vld [vmem:[#allocation0 + $0x90] sm:$0xf]  ;;  %v926_v4 = vpop.permute.xlu0 %925  }
  0xef   :  { %583 = vst.msk [vmem:[#allocation0 + $0x298] sm:$0x2] %vm22_vm0, %v578_v5   ;;  %585 = vst.msk [vmem:[#allocation0 + $0x317] sm:$0x4] %vm22_vm0, %v578_v5   ;;  %v1517_v15 = vld [vmem:[#allocation0 + $0xd0] sm:$0xf] }
  0xf0   :  { %587 = vst.msk [vmem:[#allocation0 + $0x396] sm:$0x8] %vm22_vm0, %v578_v5   ;;  %589 = vst.msk [vmem:[#allocation0 + $0x255] sm:$0x10] %vm22_vm0, %v578_v5   ;;  %v1573_v16 = vld [vmem:[#allocation0 + $0x110] sm:$0xf] }
  0xf1   :  { %591 = vst.msk [vmem:[#allocation0 + $0x2d4] sm:$0x20] %vm22_vm0, %v578_v5   ;;  %593 = vst.msk [vmem:[#allocation0 + $0x353] sm:$0x40] %vm22_vm0, %v578_v5   ;;  %v1685_v17 = vld [vmem:[#allocation0 + $0x190] sm:$0xf] }
  0xf2   :  { %595 = vst.msk [vmem:[#allocation0 + $0x3d2] sm:$0x80] %vm22_vm0, %v578_v5   ;;  %560 = vst.msk [vmem:[#allocation0 + $0x19] sm:$0x1] %vm22_vm0, %v557_v6   ;;  %v1629_v18 = vld [vmem:[#allocation0 + $0x150] sm:$0xf] }
  0xf3   :  { %562 = vst.msk [vmem:[#allocation0 + $0x98] sm:$0x2] %vm22_vm0, %v557_v6   ;;  %564 = vst.msk [vmem:[#allocation0 + $0x117] sm:$0x4] %vm22_vm0, %v557_v6   ;;  %v1741_v21 = vld [vmem:[#allocation0 + $0x1d0] sm:$0xf] }
  0xf4   :  { %566 = vst.msk [vmem:[#allocation0 + $0x196] sm:$0x8] %vm22_vm0, %v557_v6   ;;  %568 = vst.msk [vmem:[#allocation0 + $0x55] sm:$0x10] %vm22_vm0, %v557_v6  }
  0xf5   :  { %570 = vst.msk [vmem:[#allocation0 + $0xd4] sm:$0x20] %vm22_vm0, %v557_v6   ;;  %572 = vst.msk [vmem:[#allocation0 + $0x153] sm:$0x40] %vm22_vm0, %v557_v6  }
  0xf6   :  { %574 = vst.msk [vmem:[#allocation0 + $0x1d2] sm:$0x80] %vm22_vm0, %v557_v6   ;;  %2450 = vst [vmem:[%s3535_s1 + $0x168] sm:$0xf] %v1965_v7  ;;  %v988_v6 = vpop.permute.xlu1 %987   ;;  %v967_v7 = vpop.permute.xlu0 %966  }
  0xf7   :  { %2458 = vst [vmem:[%s3535_s1 + $0x188] sm:$0xf] %v2021_v8  ;;  %2466 = vst [vmem:[%s3535_s1 + $0x1a8] sm:$0xf] %v2077_v9 }
  0xf8   :  { %2474 = vst [vmem:[%s3535_s1 + $0x1c8] sm:$0xf] %v2133_v10  ;;  %2362 = vst [vmem:[%s3535_s1 + $0x8] sm:$0xf] %v1349_v12 }
  0xf9   :  { %2482 = vst [vmem:[%s3535_s1 + $0x1e8] sm:$0xf] %v2189_v11  ;;  %2370 = vst [vmem:[%s3535_s1 + $0x28] sm:$0xf] %v1405_v13 }
  0xfa   :  { %2378 = vst [vmem:[%s3535_s1 + $0x48] sm:$0xf] %v1461_v14  ;;  %2386 = vst [vmem:[%s3535_s1 + $0x68] sm:$0xf] %v1517_v15  ;;  %v1029_v8 = vpop.permute.xlu1 %1028   ;;  %v1008_v9 = vpop.permute.xlu0 %1007  }
  0xfb   :  { %2394 = vst [vmem:[%s3535_s1 + $0x88] sm:$0xf] %v1573_v16  ;;  %2410 = vst [vmem:[%s3535_s1 + $0xc8] sm:$0xf] %v1685_v17 }
  0xfc   :  { %2402 = vst [vmem:[%s3535_s1 + $0xa8] sm:$0xf] %v1629_v18  ;;  %622 = vst.msk [vmem:[#allocation0 + $0x21a] sm:$0x1] %vm22_vm0, %v619_v19  }
  0xfd   :  { %624 = vst.msk [vmem:[#allocation0 + $0x299] sm:$0x2] %vm22_vm0, %v619_v19   ;;  %626 = vst.msk [vmem:[#allocation0 + $0x318] sm:$0x4] %vm22_vm0, %v619_v19  }
  0xfe   :  { %628 = vst.msk [vmem:[#allocation0 + $0x397] sm:$0x8] %vm22_vm0, %v619_v19   ;;  %630 = vst.msk [vmem:[#allocation0 + $0x256] sm:$0x10] %vm22_vm0, %v619_v19   ;;  %v1070_v13 = vpop.permute.xlu1 %1069   ;;  %v1049_v14 = vpop.permute.xlu0 %1048  }
  0xff   :  { %632 = vst.msk [vmem:[#allocation0 + $0x2d5] sm:$0x20] %vm22_vm0, %v619_v19   ;;  %634 = vst.msk [vmem:[#allocation0 + $0x354] sm:$0x40] %vm22_vm0, %v619_v19  }
 0x100   :  { %636 = vst.msk [vmem:[#allocation0 + $0x3d3] sm:$0x80] %vm22_vm0, %v619_v19   ;;  %601 = vst.msk [vmem:[#allocation0 + $0x1a] sm:$0x1] %vm22_vm0, %v598_v20  }
 0x101   :  { %603 = vst.msk [vmem:[#allocation0 + $0x99] sm:$0x2] %vm22_vm0, %v598_v20   ;;  %605 = vst.msk [vmem:[#allocation0 + $0x118] sm:$0x4] %vm22_vm0, %v598_v20  }
 0x102   :  { %607 = vst.msk [vmem:[#allocation0 + $0x197] sm:$0x8] %vm22_vm0, %v598_v20   ;;  %609 = vst.msk [vmem:[#allocation0 + $0x56] sm:$0x10] %vm22_vm0, %v598_v20  }
 0x103   :  { %611 = vst.msk [vmem:[#allocation0 + $0xd5] sm:$0x20] %vm22_vm0, %v598_v20   ;;  %613 = vst.msk [vmem:[#allocation0 + $0x154] sm:$0x40] %vm22_vm0, %v598_v20  }
 0x104   :  { %615 = vst.msk [vmem:[#allocation0 + $0x1d3] sm:$0x80] %vm22_vm0, %v598_v20   ;;  %2418 = vst [vmem:[%s3535_s1 + $0xe8] sm:$0xf] %v1741_v21 }
 0x105   :  { %663 = vst.msk [vmem:[#allocation0 + $0x21b] sm:$0x1] %vm22_vm0, %v660_v22   ;;  %665 = vst.msk [vmem:[#allocation0 + $0x29a] sm:$0x2] %vm22_vm0, %v660_v22  }
 0x106   :  { %667 = vst.msk [vmem:[#allocation0 + $0x319] sm:$0x4] %vm22_vm0, %v660_v22   ;;  %669 = vst.msk [vmem:[#allocation0 + $0x398] sm:$0x8] %vm22_vm0, %v660_v22  }
 0x107   :  { %671 = vst.msk [vmem:[#allocation0 + $0x257] sm:$0x10] %vm22_vm0, %v660_v22   ;;  %673 = vst.msk [vmem:[#allocation0 + $0x2d6] sm:$0x20] %vm22_vm0, %v660_v22  }
 0x108   :  { %675 = vst.msk [vmem:[#allocation0 + $0x355] sm:$0x40] %vm22_vm0, %v660_v22   ;;  %677 = vst.msk [vmem:[#allocation0 + $0x3d4] sm:$0x80] %vm22_vm0, %v660_v22  }
 0x109   :  { %642 = vst.msk [vmem:[#allocation0 + $0x1b] sm:$0x1] %vm22_vm0, %v639_v23   ;;  %644 = vst.msk [vmem:[#allocation0 + $0x9a] sm:$0x2] %vm22_vm0, %v639_v23  }
 0x10a   :  { %646 = vst.msk [vmem:[#allocation0 + $0x119] sm:$0x4] %vm22_vm0, %v639_v23   ;;  %648 = vst.msk [vmem:[#allocation0 + $0x198] sm:$0x8] %vm22_vm0, %v639_v23  }
 0x10b   :  { %650 = vst.msk [vmem:[#allocation0 + $0x57] sm:$0x10] %vm22_vm0, %v639_v23   ;;  %652 = vst.msk [vmem:[#allocation0 + $0xd6] sm:$0x20] %vm22_vm0, %v639_v23  }
 0x10c   :  { %654 = vst.msk [vmem:[#allocation0 + $0x155] sm:$0x40] %vm22_vm0, %v639_v23   ;;  %656 = vst.msk [vmem:[#allocation0 + $0x1d4] sm:$0x80] %vm22_vm0, %v639_v23   ;;  %v1804_v26 = vld [vmem:[#allocation0 + $0x218] sm:$0xf] }
 0x10d   :  { %704 = vst.msk [vmem:[#allocation0 + $0x220] sm:$0x1] %vm22_vm0, %v701_v24   ;;  %706 = vst.msk [vmem:[#allocation0 + $0x29f] sm:$0x2] %vm22_vm0, %v701_v24   ;;  %v1916_v28 = vld [vmem:[#allocation0 + $0x298] sm:$0xf] }
 0x10e   :  { %708 = vst.msk [vmem:[#allocation0 + $0x31e] sm:$0x4] %vm22_vm0, %v701_v24   ;;  %710 = vst.msk [vmem:[#allocation0 + $0x39d] sm:$0x8] %vm22_vm0, %v701_v24   ;;  %v1860_v27 = vld [vmem:[#allocation0 + $0x258] sm:$0xf] }
 0x10f   :  { %712 = vst.msk [vmem:[#allocation0 + $0x25c] sm:$0x10] %vm22_vm0, %v701_v24   ;;  %714 = vst.msk [vmem:[#allocation0 + $0x2db] sm:$0x20] %vm22_vm0, %v701_v24   ;;  %v1972_v31 = vld [vmem:[#allocation0 + $0x2d8] sm:$0xf] }
 0x110   :  { %716 = vst.msk [vmem:[#allocation0 + $0x35a] sm:$0x40] %vm22_vm0, %v701_v24   ;;  %718 = vst.msk [vmem:[#allocation0 + $0x3d9] sm:$0x80] %vm22_vm0, %v701_v24   ;;  %v2028_v32 = vld [vmem:[#allocation0 + $0x318] sm:$0xf] }
 0x111   :  { %683 = vst.msk [vmem:[#allocation0 + $0x20] sm:$0x1] %vm22_vm0, %v680_v25   ;;  %685 = vst.msk [vmem:[#allocation0 + $0x9f] sm:$0x2] %vm22_vm0, %v680_v25   ;;  %v2084_v33 = vld [vmem:[#allocation0 + $0x358] sm:$0xf] }
 0x112   :  { %687 = vst.msk [vmem:[#allocation0 + $0x11e] sm:$0x4] %vm22_vm0, %v680_v25   ;;  %689 = vst.msk [vmem:[#allocation0 + $0x19d] sm:$0x8] %vm22_vm0, %v680_v25   ;;  %v2140_v34 = vld [vmem:[#allocation0 + $0x398] sm:$0xf] }
 0x113   :  { %691 = vst.msk [vmem:[#allocation0 + $0x5c] sm:$0x10] %vm22_vm0, %v680_v25   ;;  %693 = vst.msk [vmem:[#allocation0 + $0xdb] sm:$0x20] %vm22_vm0, %v680_v25   ;;  %v2196_v35 = vld [vmem:[#allocation0 + $0x3d8] sm:$0xf] }
 0x114   :  { %695 = vst.msk [vmem:[#allocation0 + $0x15a] sm:$0x40] %vm22_vm0, %v680_v25   ;;  %697 = vst.msk [vmem:[#allocation0 + $0x1d9] sm:$0x80] %vm22_vm0, %v680_v25   ;;  %v1748_v36 = vld [vmem:[#allocation0 + $0x1d8] sm:$0xf] }
 0x115   :  { %2427 = vst [vmem:[%s3535_s1 + $0x10c] sm:$0xf] %v1804_v26  ;;  %2435 = vst [vmem:[%s3535_s1 + $0x12c] sm:$0xf] %v1860_v27  ;;  %v1356_v37 = vld [vmem:[#allocation0 + $0x18] sm:$0xf]  ;;  %v1111_v27 = vpop.permute.xlu1 %1110  }
 0x116   :  { %2443 = vst [vmem:[%s3535_s1 + $0x14c] sm:$0xf] %v1916_v28  ;;  %745 = vst.msk [vmem:[#allocation0 + $0x221] sm:$0x1] %vm22_vm0, %v742_v29   ;;  %v1412_v38 = vld [vmem:[#allocation0 + $0x58] sm:$0xf]  ;;  %v1090_v28 = vpop.permute.xlu0 %1089  }
 0x117   :  { %747 = vst.msk [vmem:[#allocation0 + $0x2a0] sm:$0x2] %vm22_vm0, %v742_v29   ;;  %749 = vst.msk [vmem:[#allocation0 + $0x31f] sm:$0x4] %vm22_vm0, %v742_v29   ;;  %v1468_v39 = vld [vmem:[#allocation0 + $0x98] sm:$0xf] }
 0x118   :  { %751 = vst.msk [vmem:[#allocation0 + $0x39e] sm:$0x8] %vm22_vm0, %v742_v29   ;;  %753 = vst.msk [vmem:[#allocation0 + $0x25d] sm:$0x10] %vm22_vm0, %v742_v29   ;;  %v1524_v40 = vld [vmem:[#allocation0 + $0xd8] sm:$0xf] }
 0x119   :  { %755 = vst.msk [vmem:[#allocation0 + $0x2dc] sm:$0x20] %vm22_vm0, %v742_v29   ;;  %757 = vst.msk [vmem:[#allocation0 + $0x35b] sm:$0x40] %vm22_vm0, %v742_v29   ;;  %v1580_v41 = vld [vmem:[#allocation0 + $0x118] sm:$0xf] }
 0x11a   :  { %759 = vst.msk [vmem:[#allocation0 + $0x3da] sm:$0x80] %vm22_vm0, %v742_v29   ;;  %724 = vst.msk [vmem:[#allocation0 + $0x21] sm:$0x1] %vm22_vm0, %v721_v30   ;;  %v1636_v42 = vld [vmem:[#allocation0 + $0x158] sm:$0xf] }
 0x11b   :  { %726 = vst.msk [vmem:[#allocation0 + $0xa0] sm:$0x2] %vm22_vm0, %v721_v30   ;;  %728 = vst.msk [vmem:[#allocation0 + $0x11f] sm:$0x4] %vm22_vm0, %v721_v30   ;;  %v1692_v45 = vld [vmem:[#allocation0 + $0x198] sm:$0xf] }
 0x11c   :  { %730 = vst.msk [vmem:[#allocation0 + $0x19e] sm:$0x8] %vm22_vm0, %v721_v30   ;;  %732 = vst.msk [vmem:[#allocation0 + $0x5d] sm:$0x10] %vm22_vm0, %v721_v30  }
 0x11d   :  { %734 = vst.msk [vmem:[#allocation0 + $0xdc] sm:$0x20] %vm22_vm0, %v721_v30   ;;  %736 = vst.msk [vmem:[#allocation0 + $0x15b] sm:$0x40] %vm22_vm0, %v721_v30  }
 0x11e   :  { %738 = vst.msk [vmem:[#allocation0 + $0x1da] sm:$0x80] %vm22_vm0, %v721_v30   ;;  %2451 = vst [vmem:[%s3535_s1 + $0x16c] sm:$0xf] %v1972_v31  ;;  %v1152_v30 = vpop.permute.xlu1 %1151   ;;  %v1131_v31 = vpop.permute.xlu0 %1130  }
 0x11f   :  { %2459 = vst [vmem:[%s3535_s1 + $0x18c] sm:$0xf] %v2028_v32  ;;  %2467 = vst [vmem:[%s3535_s1 + $0x1ac] sm:$0xf] %v2084_v33 }
 0x120   :  { %2419 = vst [vmem:[%s3535_s1 + $0xec] sm:$0xf] %v1748_v36  ;;  %2475 = vst [vmem:[%s3535_s1 + $0x1cc] sm:$0xf] %v2140_v34 }
 0x121   :  { %2483 = vst [vmem:[%s3535_s1 + $0x1ec] sm:$0xf] %v2196_v35  ;;  %2363 = vst [vmem:[%s3535_s1 + $0xc] sm:$0xf] %v1356_v37 }
 0x122   :  { %2371 = vst [vmem:[%s3535_s1 + $0x2c] sm:$0xf] %v1412_v38  ;;  %2379 = vst [vmem:[%s3535_s1 + $0x4c] sm:$0xf] %v1468_v39  ;;  %v1193_v32 = vpop.permute.xlu1 %1192   ;;  %v1172_v33 = vpop.permute.xlu0 %1171  }
 0x123   :  { %2387 = vst [vmem:[%s3535_s1 + $0x6c] sm:$0xf] %v1524_v40  ;;  %2395 = vst [vmem:[%s3535_s1 + $0x8c] sm:$0xf] %v1580_v41 }
 0x124   :  { %2403 = vst [vmem:[%s3535_s1 + $0xac] sm:$0xf] %v1636_v42  ;;  %786 = vst.msk [vmem:[#allocation0 + $0x222] sm:$0x1] %vm22_vm0, %v783_v43  }
 0x125   :  { %788 = vst.msk [vmem:[#allocation0 + $0x2a1] sm:$0x2] %vm22_vm0, %v783_v43   ;;  %790 = vst.msk [vmem:[#allocation0 + $0x320] sm:$0x4] %vm22_vm0, %v783_v43  }
 0x126   :  { %792 = vst.msk [vmem:[#allocation0 + $0x39f] sm:$0x8] %vm22_vm0, %v783_v43   ;;  %794 = vst.msk [vmem:[#allocation0 + $0x25e] sm:$0x10] %vm22_vm0, %v783_v43   ;;  %v1234_v37 = vpop.permute.xlu1 %1233   ;;  %v1213_v38 = vpop.permute.xlu0 %1212  }
 0x127   :  { %796 = vst.msk [vmem:[#allocation0 + $0x2dd] sm:$0x20] %vm22_vm0, %v783_v43   ;;  %798 = vst.msk [vmem:[#allocation0 + $0x35c] sm:$0x40] %vm22_vm0, %v783_v43  }
 0x128   :  { %800 = vst.msk [vmem:[#allocation0 + $0x3db] sm:$0x80] %vm22_vm0, %v783_v43   ;;  %765 = vst.msk [vmem:[#allocation0 + $0x22] sm:$0x1] %vm22_vm0, %v762_v44  }
 0x129   :  { %767 = vst.msk [vmem:[#allocation0 + $0xa1] sm:$0x2] %vm22_vm0, %v762_v44   ;;  %769 = vst.msk [vmem:[#allocation0 + $0x120] sm:$0x4] %vm22_vm0, %v762_v44  }
 0x12a   :  { %771 = vst.msk [vmem:[#allocation0 + $0x19f] sm:$0x8] %vm22_vm0, %v762_v44   ;;  %773 = vst.msk [vmem:[#allocation0 + $0x5e] sm:$0x10] %vm22_vm0, %v762_v44  }
 0x12b   :  { %775 = vst.msk [vmem:[#allocation0 + $0xdd] sm:$0x20] %vm22_vm0, %v762_v44   ;;  %777 = vst.msk [vmem:[#allocation0 + $0x15c] sm:$0x40] %vm22_vm0, %v762_v44  }
 0x12c   :  { %779 = vst.msk [vmem:[#allocation0 + $0x1db] sm:$0x80] %vm22_vm0, %v762_v44   ;;  %2411 = vst [vmem:[%s3535_s1 + $0xcc] sm:$0xf] %v1692_v45 }
 0x12d   :  { %827 = vst.msk [vmem:[#allocation0 + $0x223] sm:$0x1] %vm22_vm0, %v824_v46   ;;  %829 = vst.msk [vmem:[#allocation0 + $0x2a2] sm:$0x2] %vm22_vm0, %v824_v46  }
 0x12e   :  { %831 = vst.msk [vmem:[#allocation0 + $0x321] sm:$0x4] %vm22_vm0, %v824_v46   ;;  %833 = vst.msk [vmem:[#allocation0 + $0x3a0] sm:$0x8] %vm22_vm0, %v824_v46  }
 0x12f   :  { %835 = vst.msk [vmem:[#allocation0 + $0x25f] sm:$0x10] %vm22_vm0, %v824_v46   ;;  %837 = vst.msk [vmem:[#allocation0 + $0x2de] sm:$0x20] %vm22_vm0, %v824_v46  }
 0x130   :  { %839 = vst.msk [vmem:[#allocation0 + $0x35d] sm:$0x40] %vm22_vm0, %v824_v46   ;;  %841 = vst.msk [vmem:[#allocation0 + $0x3dc] sm:$0x80] %vm22_vm0, %v824_v46  }
 0x131   :  { %806 = vst.msk [vmem:[#allocation0 + $0x23] sm:$0x1] %vm22_vm0, %v803_v47   ;;  %808 = vst.msk [vmem:[#allocation0 + $0xa2] sm:$0x2] %vm22_vm0, %v803_v47  }
 0x132   :  { %810 = vst.msk [vmem:[#allocation0 + $0x121] sm:$0x4] %vm22_vm0, %v803_v47   ;;  %812 = vst.msk [vmem:[#allocation0 + $0x1a0] sm:$0x8] %vm22_vm0, %v803_v47  }
 0x133   :  { %814 = vst.msk [vmem:[#allocation0 + $0x5f] sm:$0x10] %vm22_vm0, %v803_v47   ;;  %816 = vst.msk [vmem:[#allocation0 + $0xde] sm:$0x20] %vm22_vm0, %v803_v47  }
 0x134   :  { %818 = vst.msk [vmem:[#allocation0 + $0x15d] sm:$0x40] %vm22_vm0, %v803_v47   ;;  %820 = vst.msk [vmem:[#allocation0 + $0x1dc] sm:$0x80] %vm22_vm0, %v803_v47   ;;  %v1811_v50 = vld [vmem:[#allocation0 + $0x220] sm:$0xf] }
 0x135   :  { %868 = vst.msk [vmem:[#allocation0 + $0x228] sm:$0x1] %vm22_vm0, %v865_v48   ;;  %870 = vst.msk [vmem:[#allocation0 + $0x2a7] sm:$0x2] %vm22_vm0, %v865_v48   ;;  %v1923_v52 = vld [vmem:[#allocation0 + $0x2a0] sm:$0xf] }
 0x136   :  { %872 = vst.msk [vmem:[#allocation0 + $0x326] sm:$0x4] %vm22_vm0, %v865_v48   ;;  %874 = vst.msk [vmem:[#allocation0 + $0x3a5] sm:$0x8] %vm22_vm0, %v865_v48   ;;  %v1867_v51 = vld [vmem:[#allocation0 + $0x260] sm:$0xf] }
 0x137   :  { %876 = vst.msk [vmem:[#allocation0 + $0x264] sm:$0x10] %vm22_vm0, %v865_v48   ;;  %878 = vst.msk [vmem:[#allocation0 + $0x2e3] sm:$0x20] %vm22_vm0, %v865_v48   ;;  %v1979_v55 = vld [vmem:[#allocation0 + $0x2e0] sm:$0xf] }
 0x138   :  { %880 = vst.msk [vmem:[#allocation0 + $0x362] sm:$0x40] %vm22_vm0, %v865_v48   ;;  %882 = vst.msk [vmem:[#allocation0 + $0x3e1] sm:$0x80] %vm22_vm0, %v865_v48   ;;  %v2035_v56 = vld [vmem:[#allocation0 + $0x320] sm:$0xf] }
 0x139   :  { %847 = vst.msk [vmem:[#allocation0 + $0x28] sm:$0x1] %vm22_vm0, %v844_v49   ;;  %849 = vst.msk [vmem:[#allocation0 + $0xa7] sm:$0x2] %vm22_vm0, %v844_v49   ;;  %v2147_v57 = vld [vmem:[#allocation0 + $0x3a0] sm:$0xf] }
 0x13a   :  { %851 = vst.msk [vmem:[#allocation0 + $0x126] sm:$0x4] %vm22_vm0, %v844_v49   ;;  %853 = vst.msk [vmem:[#allocation0 + $0x1a5] sm:$0x8] %vm22_vm0, %v844_v49   ;;  %v2091_v58 = vld [vmem:[#allocation0 + $0x360] sm:$0xf] }
 0x13b   :  { %855 = vst.msk [vmem:[#allocation0 + $0x64] sm:$0x10] %vm22_vm0, %v844_v49   ;;  %857 = vst.msk [vmem:[#allocation0 + $0xe3] sm:$0x20] %vm22_vm0, %v844_v49   ;;  %v2203_v59 = vld [vmem:[#allocation0 + $0x3e0] sm:$0xf] }
 0x13c   :  { %859 = vst.msk [vmem:[#allocation0 + $0x162] sm:$0x40] %vm22_vm0, %v844_v49   ;;  %861 = vst.msk [vmem:[#allocation0 + $0x1e1] sm:$0x80] %vm22_vm0, %v844_v49   ;;  %v1363_v60 = vld [vmem:[#allocation0 + $0x20] sm:$0xf] }
 0x13d   :  { %2428 = vst [vmem:[%s3535_s1 + $0x110] sm:$0xf] %v1811_v50  ;;  %2436 = vst [vmem:[%s3535_s1 + $0x130] sm:$0xf] %v1867_v51  ;;  %v1419_v61 = vld [vmem:[#allocation0 + $0x60] sm:$0xf]  ;;  %v1275_v51 = vpop.permute.xlu1 %1274  }
 0x13e   :  { %2444 = vst [vmem:[%s3535_s1 + $0x150] sm:$0xf] %v1923_v52  ;;  %909 = vst.msk [vmem:[#allocation0 + $0x229] sm:$0x1] %vm22_vm0, %v906_v53   ;;  %v1475_v62 = vld [vmem:[#allocation0 + $0xa0] sm:$0xf]  ;;  %v1254_v52 = vpop.permute.xlu0 %1253  }
 0x13f   :  { %911 = vst.msk [vmem:[#allocation0 + $0x2a8] sm:$0x2] %vm22_vm0, %v906_v53   ;;  %913 = vst.msk [vmem:[#allocation0 + $0x327] sm:$0x4] %vm22_vm0, %v906_v53   ;;  %v1531_v63 = vld [vmem:[#allocation0 + $0xe0] sm:$0xf] }
 0x140   :  { %915 = vst.msk [vmem:[#allocation0 + $0x3a6] sm:$0x8] %vm22_vm0, %v906_v53   ;;  %917 = vst.msk [vmem:[#allocation0 + $0x265] sm:$0x10] %vm22_vm0, %v906_v53   ;;  %v1587_v0 = vld [vmem:[#allocation0 + $0x120] sm:$0xf] }
 0x141   :  { %919 = vst.msk [vmem:[#allocation0 + $0x2e4] sm:$0x20] %vm22_vm0, %v906_v53   ;;  %921 = vst.msk [vmem:[#allocation0 + $0x363] sm:$0x40] %vm22_vm0, %v906_v53   ;;  %v1643_v1 = vld [vmem:[#allocation0 + $0x160] sm:$0xf] }
 0x142   :  { %923 = vst.msk [vmem:[#allocation0 + $0x3e2] sm:$0x80] %vm22_vm0, %v906_v53   ;;  %888 = vst.msk [vmem:[#allocation0 + $0x29] sm:$0x1] %vm22_vm0, %v885_v54   ;;  %v1699_v2 = vld [vmem:[#allocation0 + $0x1a0] sm:$0xf] }
 0x143   :  { %890 = vst.msk [vmem:[#allocation0 + $0xa8] sm:$0x2] %vm22_vm0, %v885_v54   ;;  %892 = vst.msk [vmem:[#allocation0 + $0x127] sm:$0x4] %vm22_vm0, %v885_v54   ;;  %v1755_v5 = vld [vmem:[#allocation0 + $0x1e0] sm:$0xf] }
 0x144   :  { %894 = vst.msk [vmem:[#allocation0 + $0x1a6] sm:$0x8] %vm22_vm0, %v885_v54   ;;  %896 = vst.msk [vmem:[#allocation0 + $0x65] sm:$0x10] %vm22_vm0, %v885_v54  }
 0x145   :  { %898 = vst.msk [vmem:[#allocation0 + $0xe4] sm:$0x20] %vm22_vm0, %v885_v54   ;;  %900 = vst.msk [vmem:[#allocation0 + $0x163] sm:$0x40] %vm22_vm0, %v885_v54  }
 0x146   :  { %902 = vst.msk [vmem:[#allocation0 + $0x1e2] sm:$0x80] %vm22_vm0, %v885_v54   ;;  %2452 = vst [vmem:[%s3535_s1 + $0x170] sm:$0xf] %v1979_v55  ;;  %v1316_v54 = vpop.permute.xlu1 %1315   ;;  %v1295_v55 = vpop.permute.xlu0 %1294  }
 0x147   :  { %2460 = vst [vmem:[%s3535_s1 + $0x190] sm:$0xf] %v2035_v56  ;;  %2476 = vst [vmem:[%s3535_s1 + $0x1d0] sm:$0xf] %v2147_v57 }
 0x148   :  { %2364 = vst [vmem:[%s3535_s1 + $0x10] sm:$0xf] %v1363_v60  ;;  %2468 = vst [vmem:[%s3535_s1 + $0x1b0] sm:$0xf] %v2091_v58 }
 0x149   :  { %2484 = vst [vmem:[%s3535_s1 + $0x1f0] sm:$0xf] %v2203_v59  ;;  %2372 = vst [vmem:[%s3535_s1 + $0x30] sm:$0xf] %v1419_v61 }
 0x14a   :  { %2380 = vst [vmem:[%s3535_s1 + $0x50] sm:$0xf] %v1475_v62  ;;  %2388 = vst [vmem:[%s3535_s1 + $0x70] sm:$0xf] %v1531_v63 }
 0x14b   :  { %2396 = vst [vmem:[%s3535_s1 + $0x90] sm:$0xf] %v1587_v0  ;;  %2404 = vst [vmem:[%s3535_s1 + $0xb0] sm:$0xf] %v1643_v1 }
 0x14c   :  { %2412 = vst [vmem:[%s3535_s1 + $0xd0] sm:$0xf] %v1699_v2  ;;  %950 = vst.msk [vmem:[#allocation0 + $0x22a] sm:$0x1] %vm22_vm0, %v947_v3  }
 0x14d   :  { %952 = vst.msk [vmem:[#allocation0 + $0x2a9] sm:$0x2] %vm22_vm0, %v947_v3   ;;  %954 = vst.msk [vmem:[#allocation0 + $0x328] sm:$0x4] %vm22_vm0, %v947_v3  }
 0x14e   :  { %956 = vst.msk [vmem:[#allocation0 + $0x3a7] sm:$0x8] %vm22_vm0, %v947_v3   ;;  %958 = vst.msk [vmem:[#allocation0 + $0x266] sm:$0x10] %vm22_vm0, %v947_v3  }
 0x14f   :  { %960 = vst.msk [vmem:[#allocation0 + $0x2e5] sm:$0x20] %vm22_vm0, %v947_v3   ;;  %962 = vst.msk [vmem:[#allocation0 + $0x364] sm:$0x40] %vm22_vm0, %v947_v3  }
 0x150   :  { %964 = vst.msk [vmem:[#allocation0 + $0x3e3] sm:$0x80] %vm22_vm0, %v947_v3   ;;  %929 = vst.msk [vmem:[#allocation0 + $0x2a] sm:$0x1] %vm22_vm0, %v926_v4  }
 0x151   :  { %931 = vst.msk [vmem:[#allocation0 + $0xa9] sm:$0x2] %vm22_vm0, %v926_v4   ;;  %933 = vst.msk [vmem:[#allocation0 + $0x128] sm:$0x4] %vm22_vm0, %v926_v4  }
 0x152   :  { %935 = vst.msk [vmem:[#allocation0 + $0x1a7] sm:$0x8] %vm22_vm0, %v926_v4   ;;  %937 = vst.msk [vmem:[#allocation0 + $0x66] sm:$0x10] %vm22_vm0, %v926_v4  }
 0x153   :  { %939 = vst.msk [vmem:[#allocation0 + $0xe5] sm:$0x20] %vm22_vm0, %v926_v4   ;;  %941 = vst.msk [vmem:[#allocation0 + $0x164] sm:$0x40] %vm22_vm0, %v926_v4  }
 0x154   :  { %943 = vst.msk [vmem:[#allocation0 + $0x1e3] sm:$0x80] %vm22_vm0, %v926_v4   ;;  %2420 = vst [vmem:[%s3535_s1 + $0xf0] sm:$0xf] %v1755_v5 }
 0x155   :  { %991 = vst.msk [vmem:[#allocation0 + $0x22b] sm:$0x1] %vm22_vm0, %v988_v6   ;;  %993 = vst.msk [vmem:[#allocation0 + $0x2aa] sm:$0x2] %vm22_vm0, %v988_v6  }
 0x156   :  { %995 = vst.msk [vmem:[#allocation0 + $0x329] sm:$0x4] %vm22_vm0, %v988_v6   ;;  %997 = vst.msk [vmem:[#allocation0 + $0x3a8] sm:$0x8] %vm22_vm0, %v988_v6  }
 0x157   :  { %999 = vst.msk [vmem:[#allocation0 + $0x267] sm:$0x10] %vm22_vm0, %v988_v6   ;;  %1001 = vst.msk [vmem:[#allocation0 + $0x2e6] sm:$0x20] %vm22_vm0, %v988_v6  }
 0x158   :  { %1003 = vst.msk [vmem:[#allocation0 + $0x365] sm:$0x40] %vm22_vm0, %v988_v6   ;;  %1005 = vst.msk [vmem:[#allocation0 + $0x3e4] sm:$0x80] %vm22_vm0, %v988_v6  }
 0x159   :  { %970 = vst.msk [vmem:[#allocation0 + $0x2b] sm:$0x1] %vm22_vm0, %v967_v7   ;;  %972 = vst.msk [vmem:[#allocation0 + $0xaa] sm:$0x2] %vm22_vm0, %v967_v7  }
 0x15a   :  { %974 = vst.msk [vmem:[#allocation0 + $0x129] sm:$0x4] %vm22_vm0, %v967_v7   ;;  %976 = vst.msk [vmem:[#allocation0 + $0x1a8] sm:$0x8] %vm22_vm0, %v967_v7  }
 0x15b   :  { %978 = vst.msk [vmem:[#allocation0 + $0x67] sm:$0x10] %vm22_vm0, %v967_v7   ;;  %980 = vst.msk [vmem:[#allocation0 + $0xe6] sm:$0x20] %vm22_vm0, %v967_v7  }
 0x15c   :  { %982 = vst.msk [vmem:[#allocation0 + $0x165] sm:$0x40] %vm22_vm0, %v967_v7   ;;  %984 = vst.msk [vmem:[#allocation0 + $0x1e4] sm:$0x80] %vm22_vm0, %v967_v7   ;;  %v1818_v10 = vld [vmem:[#allocation0 + $0x228] sm:$0xf] }
 0x15d   :  { %1032 = vst.msk [vmem:[#allocation0 + $0x230] sm:$0x1] %vm22_vm0, %v1029_v8   ;;  %1034 = vst.msk [vmem:[#allocation0 + $0x2af] sm:$0x2] %vm22_vm0, %v1029_v8   ;;  %v1930_v12 = vld [vmem:[#allocation0 + $0x2a8] sm:$0xf] }
 0x15e   :  { %1036 = vst.msk [vmem:[#allocation0 + $0x32e] sm:$0x4] %vm22_vm0, %v1029_v8   ;;  %1038 = vst.msk [vmem:[#allocation0 + $0x3ad] sm:$0x8] %vm22_vm0, %v1029_v8   ;;  %v1874_v11 = vld [vmem:[#allocation0 + $0x268] sm:$0xf] }
 0x15f   :  { %1040 = vst.msk [vmem:[#allocation0 + $0x26c] sm:$0x10] %vm22_vm0, %v1029_v8   ;;  %1042 = vst.msk [vmem:[#allocation0 + $0x2eb] sm:$0x20] %vm22_vm0, %v1029_v8   ;;  %v1986_v15 = vld [vmem:[#allocation0 + $0x2e8] sm:$0xf] }
 0x160   :  { %1044 = vst.msk [vmem:[#allocation0 + $0x36a] sm:$0x40] %vm22_vm0, %v1029_v8   ;;  %1046 = vst.msk [vmem:[#allocation0 + $0x3e9] sm:$0x80] %vm22_vm0, %v1029_v8   ;;  %v2154_v16 = vld [vmem:[#allocation0 + $0x3a8] sm:$0xf] }
 0x161   :  { %1011 = vst.msk [vmem:[#allocation0 + $0x30] sm:$0x1] %vm22_vm0, %v1008_v9   ;;  %1013 = vst.msk [vmem:[#allocation0 + $0xaf] sm:$0x2] %vm22_vm0, %v1008_v9   ;;  %v2210_v17 = vld [vmem:[#allocation0 + $0x3e8] sm:$0xf] }
 0x162   :  { %1015 = vst.msk [vmem:[#allocation0 + $0x12e] sm:$0x4] %vm22_vm0, %v1008_v9   ;;  %1017 = vst.msk [vmem:[#allocation0 + $0x1ad] sm:$0x8] %vm22_vm0, %v1008_v9   ;;  %v2042_v18 = vld [vmem:[#allocation0 + $0x328] sm:$0xf] }
 0x163   :  { %1019 = vst.msk [vmem:[#allocation0 + $0x6c] sm:$0x10] %vm22_vm0, %v1008_v9   ;;  %1021 = vst.msk [vmem:[#allocation0 + $0xeb] sm:$0x20] %vm22_vm0, %v1008_v9   ;;  %v2098_v19 = vld [vmem:[#allocation0 + $0x368] sm:$0xf] }
 0x164   :  { %1023 = vst.msk [vmem:[#allocation0 + $0x16a] sm:$0x40] %vm22_vm0, %v1008_v9   ;;  %1025 = vst.msk [vmem:[#allocation0 + $0x1e9] sm:$0x80] %vm22_vm0, %v1008_v9   ;;  %v1370_v20 = vld [vmem:[#allocation0 + $0x28] sm:$0xf] }
 0x165   :  { %2429 = vst [vmem:[%s3535_s1 + $0x114] sm:$0xf] %v1818_v10  ;;  %2437 = vst [vmem:[%s3535_s1 + $0x134] sm:$0xf] %v1874_v11  ;;  %v1426_v21 = vld [vmem:[#allocation0 + $0x68] sm:$0xf] }
 0x166   :  { %2445 = vst [vmem:[%s3535_s1 + $0x154] sm:$0xf] %v1930_v12  ;;  %1073 = vst.msk [vmem:[#allocation0 + $0x231] sm:$0x1] %vm22_vm0, %v1070_v13   ;;  %v1482_v22 = vld [vmem:[#allocation0 + $0xa8] sm:$0xf] }
 0x167   :  { %1075 = vst.msk [vmem:[#allocation0 + $0x2b0] sm:$0x2] %vm22_vm0, %v1070_v13   ;;  %1077 = vst.msk [vmem:[#allocation0 + $0x32f] sm:$0x4] %vm22_vm0, %v1070_v13   ;;  %v1538_v23 = vld [vmem:[#allocation0 + $0xe8] sm:$0xf] }
 0x168   :  { %1079 = vst.msk [vmem:[#allocation0 + $0x3ae] sm:$0x8] %vm22_vm0, %v1070_v13   ;;  %1081 = vst.msk [vmem:[#allocation0 + $0x26d] sm:$0x10] %vm22_vm0, %v1070_v13   ;;  %v1594_v24 = vld [vmem:[#allocation0 + $0x128] sm:$0xf] }
 0x169   :  { %1083 = vst.msk [vmem:[#allocation0 + $0x2ec] sm:$0x20] %vm22_vm0, %v1070_v13   ;;  %1085 = vst.msk [vmem:[#allocation0 + $0x36b] sm:$0x40] %vm22_vm0, %v1070_v13   ;;  %v1650_v25 = vld [vmem:[#allocation0 + $0x168] sm:$0xf] }
 0x16a   :  { %1087 = vst.msk [vmem:[#allocation0 + $0x3ea] sm:$0x80] %vm22_vm0, %v1070_v13   ;;  %1052 = vst.msk [vmem:[#allocation0 + $0x31] sm:$0x1] %vm22_vm0, %v1049_v14   ;;  %v1762_v26 = vld [vmem:[#allocation0 + $0x1e8] sm:$0xf] }
 0x16b   :  { %1054 = vst.msk [vmem:[#allocation0 + $0xb0] sm:$0x2] %vm22_vm0, %v1049_v14   ;;  %1056 = vst.msk [vmem:[#allocation0 + $0x12f] sm:$0x4] %vm22_vm0, %v1049_v14   ;;  %v1706_v29 = vld [vmem:[#allocation0 + $0x1a8] sm:$0xf] }
 0x16c   :  { %1058 = vst.msk [vmem:[#allocation0 + $0x1ae] sm:$0x8] %vm22_vm0, %v1049_v14   ;;  %1060 = vst.msk [vmem:[#allocation0 + $0x6d] sm:$0x10] %vm22_vm0, %v1049_v14  }
 0x16d   :  { %1062 = vst.msk [vmem:[#allocation0 + $0xec] sm:$0x20] %vm22_vm0, %v1049_v14   ;;  %1064 = vst.msk [vmem:[#allocation0 + $0x16b] sm:$0x40] %vm22_vm0, %v1049_v14  }
 0x16e   :  { %1066 = vst.msk [vmem:[#allocation0 + $0x1ea] sm:$0x80] %vm22_vm0, %v1049_v14   ;;  %2453 = vst [vmem:[%s3535_s1 + $0x174] sm:$0xf] %v1986_v15 }
 0x16f   :  { %2477 = vst [vmem:[%s3535_s1 + $0x1d4] sm:$0xf] %v2154_v16  ;;  %2485 = vst [vmem:[%s3535_s1 + $0x1f4] sm:$0xf] %v2210_v17 }
 0x170   :  { %2365 = vst [vmem:[%s3535_s1 + $0x14] sm:$0xf] %v1370_v20  ;;  %2461 = vst [vmem:[%s3535_s1 + $0x194] sm:$0xf] %v2042_v18 }
 0x171   :  { %2469 = vst [vmem:[%s3535_s1 + $0x1b4] sm:$0xf] %v2098_v19  ;;  %2373 = vst [vmem:[%s3535_s1 + $0x34] sm:$0xf] %v1426_v21 }
 0x172   :  { %2381 = vst [vmem:[%s3535_s1 + $0x54] sm:$0xf] %v1482_v22  ;;  %2389 = vst [vmem:[%s3535_s1 + $0x74] sm:$0xf] %v1538_v23 }
 0x173   :  { %2397 = vst [vmem:[%s3535_s1 + $0x94] sm:$0xf] %v1594_v24  ;;  %2405 = vst [vmem:[%s3535_s1 + $0xb4] sm:$0xf] %v1650_v25 }
 0x174   :  { %2421 = vst [vmem:[%s3535_s1 + $0xf4] sm:$0xf] %v1762_v26  ;;  %1114 = vst.msk [vmem:[#allocation0 + $0x232] sm:$0x1] %vm22_vm0, %v1111_v27  }
 0x175   :  { %1116 = vst.msk [vmem:[#allocation0 + $0x2b1] sm:$0x2] %vm22_vm0, %v1111_v27   ;;  %1118 = vst.msk [vmem:[#allocation0 + $0x330] sm:$0x4] %vm22_vm0, %v1111_v27  }
 0x176   :  { %1120 = vst.msk [vmem:[#allocation0 + $0x3af] sm:$0x8] %vm22_vm0, %v1111_v27   ;;  %1122 = vst.msk [vmem:[#allocation0 + $0x26e] sm:$0x10] %vm22_vm0, %v1111_v27  }
 0x177   :  { %1124 = vst.msk [vmem:[#allocation0 + $0x2ed] sm:$0x20] %vm22_vm0, %v1111_v27   ;;  %1126 = vst.msk [vmem:[#allocation0 + $0x36c] sm:$0x40] %vm22_vm0, %v1111_v27  }
 0x178   :  { %1128 = vst.msk [vmem:[#allocation0 + $0x3eb] sm:$0x80] %vm22_vm0, %v1111_v27   ;;  %1093 = vst.msk [vmem:[#allocation0 + $0x32] sm:$0x1] %vm22_vm0, %v1090_v28  }
 0x179   :  { %1095 = vst.msk [vmem:[#allocation0 + $0xb1] sm:$0x2] %vm22_vm0, %v1090_v28   ;;  %1097 = vst.msk [vmem:[#allocation0 + $0x130] sm:$0x4] %vm22_vm0, %v1090_v28  }
 0x17a   :  { %1099 = vst.msk [vmem:[#allocation0 + $0x1af] sm:$0x8] %vm22_vm0, %v1090_v28   ;;  %1101 = vst.msk [vmem:[#allocation0 + $0x6e] sm:$0x10] %vm22_vm0, %v1090_v28  }
 0x17b   :  { %1103 = vst.msk [vmem:[#allocation0 + $0xed] sm:$0x20] %vm22_vm0, %v1090_v28   ;;  %1105 = vst.msk [vmem:[#allocation0 + $0x16c] sm:$0x40] %vm22_vm0, %v1090_v28  }
 0x17c   :  { %1107 = vst.msk [vmem:[#allocation0 + $0x1eb] sm:$0x80] %vm22_vm0, %v1090_v28   ;;  %2413 = vst [vmem:[%s3535_s1 + $0xd4] sm:$0xf] %v1706_v29 }
 0x17d   :  { %1155 = vst.msk [vmem:[#allocation0 + $0x233] sm:$0x1] %vm22_vm0, %v1152_v30   ;;  %1157 = vst.msk [vmem:[#allocation0 + $0x2b2] sm:$0x2] %vm22_vm0, %v1152_v30  }
 0x17e   :  { %1159 = vst.msk [vmem:[#allocation0 + $0x331] sm:$0x4] %vm22_vm0, %v1152_v30   ;;  %1161 = vst.msk [vmem:[#allocation0 + $0x3b0] sm:$0x8] %vm22_vm0, %v1152_v30  }
 0x17f   :  { %1163 = vst.msk [vmem:[#allocation0 + $0x26f] sm:$0x10] %vm22_vm0, %v1152_v30   ;;  %1165 = vst.msk [vmem:[#allocation0 + $0x2ee] sm:$0x20] %vm22_vm0, %v1152_v30  }
 0x180   :  { %1167 = vst.msk [vmem:[#allocation0 + $0x36d] sm:$0x40] %vm22_vm0, %v1152_v30   ;;  %1169 = vst.msk [vmem:[#allocation0 + $0x3ec] sm:$0x80] %vm22_vm0, %v1152_v30  }
 0x181   :  { %1134 = vst.msk [vmem:[#allocation0 + $0x33] sm:$0x1] %vm22_vm0, %v1131_v31   ;;  %1136 = vst.msk [vmem:[#allocation0 + $0xb2] sm:$0x2] %vm22_vm0, %v1131_v31  }
 0x182   :  { %1138 = vst.msk [vmem:[#allocation0 + $0x131] sm:$0x4] %vm22_vm0, %v1131_v31   ;;  %1140 = vst.msk [vmem:[#allocation0 + $0x1b0] sm:$0x8] %vm22_vm0, %v1131_v31  }
 0x183   :  { %1142 = vst.msk [vmem:[#allocation0 + $0x6f] sm:$0x10] %vm22_vm0, %v1131_v31   ;;  %1144 = vst.msk [vmem:[#allocation0 + $0xee] sm:$0x20] %vm22_vm0, %v1131_v31  }
 0x184   :  { %1146 = vst.msk [vmem:[#allocation0 + $0x16d] sm:$0x40] %vm22_vm0, %v1131_v31   ;;  %1148 = vst.msk [vmem:[#allocation0 + $0x1ec] sm:$0x80] %vm22_vm0, %v1131_v31   ;;  %v1825_v34 = vld [vmem:[#allocation0 + $0x230] sm:$0xf] }
 0x185   :  { %1196 = vst.msk [vmem:[#allocation0 + $0x238] sm:$0x1] %vm22_vm0, %v1193_v32   ;;  %1198 = vst.msk [vmem:[#allocation0 + $0x2b7] sm:$0x2] %vm22_vm0, %v1193_v32   ;;  %v2049_v35 = vld [vmem:[#allocation0 + $0x330] sm:$0xf] }
 0x186   :  { %1200 = vst.msk [vmem:[#allocation0 + $0x336] sm:$0x4] %vm22_vm0, %v1193_v32   ;;  %1202 = vst.msk [vmem:[#allocation0 + $0x3b5] sm:$0x8] %vm22_vm0, %v1193_v32   ;;  %v1881_v40 = vld [vmem:[#allocation0 + $0x270] sm:$0xf] }
 0x187   :  { %1204 = vst.msk [vmem:[#allocation0 + $0x274] sm:$0x10] %vm22_vm0, %v1193_v32   ;;  %1206 = vst.msk [vmem:[#allocation0 + $0x2f3] sm:$0x20] %vm22_vm0, %v1193_v32   ;;  %v2105_v36 = vld [vmem:[#allocation0 + $0x370] sm:$0xf] }
 0x188   :  { %1208 = vst.msk [vmem:[#allocation0 + $0x372] sm:$0x40] %vm22_vm0, %v1193_v32   ;;  %1210 = vst.msk [vmem:[#allocation0 + $0x3f1] sm:$0x80] %vm22_vm0, %v1193_v32   ;;  %v2217_v39 = vld [vmem:[#allocation0 + $0x3f0] sm:$0xf] }
 0x189   :  { %1175 = vst.msk [vmem:[#allocation0 + $0x38] sm:$0x1] %vm22_vm0, %v1172_v33   ;;  %1177 = vst.msk [vmem:[#allocation0 + $0xb7] sm:$0x2] %vm22_vm0, %v1172_v33   ;;  %v1937_v41 = vld [vmem:[#allocation0 + $0x2b0] sm:$0xf] }
 0x18a   :  { %1179 = vst.msk [vmem:[#allocation0 + $0x136] sm:$0x4] %vm22_vm0, %v1172_v33   ;;  %1181 = vst.msk [vmem:[#allocation0 + $0x1b5] sm:$0x8] %vm22_vm0, %v1172_v33   ;;  %v1993_v42 = vld [vmem:[#allocation0 + $0x2f0] sm:$0xf] }
 0x18b   :  { %1183 = vst.msk [vmem:[#allocation0 + $0x74] sm:$0x10] %vm22_vm0, %v1172_v33   ;;  %1185 = vst.msk [vmem:[#allocation0 + $0xf3] sm:$0x20] %vm22_vm0, %v1172_v33   ;;  %v2161_v43 = vld [vmem:[#allocation0 + $0x3b0] sm:$0xf] }
 0x18c   :  { %1187 = vst.msk [vmem:[#allocation0 + $0x172] sm:$0x40] %vm22_vm0, %v1172_v33   ;;  %1189 = vst.msk [vmem:[#allocation0 + $0x1f1] sm:$0x80] %vm22_vm0, %v1172_v33   ;;  %v1769_v44 = vld [vmem:[#allocation0 + $0x1f0] sm:$0xf] }
 0x18d   :  { %2430 = vst [vmem:[%s3535_s1 + $0x118] sm:$0xf] %v1825_v34  ;;  %2462 = vst [vmem:[%s3535_s1 + $0x198] sm:$0xf] %v2049_v35  ;;  %v1377_v45 = vld [vmem:[#allocation0 + $0x30] sm:$0xf] }
 0x18e   :  { %2470 = vst [vmem:[%s3535_s1 + $0x1b8] sm:$0xf] %v2105_v36  ;;  %1237 = vst.msk [vmem:[#allocation0 + $0x239] sm:$0x1] %vm22_vm0, %v1234_v37   ;;  %v1433_v46 = vld [vmem:[#allocation0 + $0x70] sm:$0xf] }
 0x18f   :  { %1239 = vst.msk [vmem:[#allocation0 + $0x2b8] sm:$0x2] %vm22_vm0, %v1234_v37   ;;  %1241 = vst.msk [vmem:[#allocation0 + $0x337] sm:$0x4] %vm22_vm0, %v1234_v37   ;;  %v1489_v47 = vld [vmem:[#allocation0 + $0xb0] sm:$0xf] }
 0x190   :  { %1243 = vst.msk [vmem:[#allocation0 + $0x3b6] sm:$0x8] %vm22_vm0, %v1234_v37   ;;  %1245 = vst.msk [vmem:[#allocation0 + $0x275] sm:$0x10] %vm22_vm0, %v1234_v37   ;;  %v1545_v48 = vld [vmem:[#allocation0 + $0xf0] sm:$0xf] }
 0x191   :  { %1247 = vst.msk [vmem:[#allocation0 + $0x2f4] sm:$0x20] %vm22_vm0, %v1234_v37   ;;  %1249 = vst.msk [vmem:[#allocation0 + $0x373] sm:$0x40] %vm22_vm0, %v1234_v37   ;;  %v1601_v49 = vld [vmem:[#allocation0 + $0x130] sm:$0xf] }
 0x192   :  { %1251 = vst.msk [vmem:[#allocation0 + $0x3f2] sm:$0x80] %vm22_vm0, %v1234_v37   ;;  %1216 = vst.msk [vmem:[#allocation0 + $0x39] sm:$0x1] %vm22_vm0, %v1213_v38   ;;  %v1657_v50 = vld [vmem:[#allocation0 + $0x170] sm:$0xf] }
 0x193   :  { %1218 = vst.msk [vmem:[#allocation0 + $0xb8] sm:$0x2] %vm22_vm0, %v1213_v38   ;;  %1220 = vst.msk [vmem:[#allocation0 + $0x137] sm:$0x4] %vm22_vm0, %v1213_v38   ;;  %v1713_v53 = vld [vmem:[#allocation0 + $0x1b0] sm:$0xf] }
 0x194   :  { %1222 = vst.msk [vmem:[#allocation0 + $0x1b6] sm:$0x8] %vm22_vm0, %v1213_v38   ;;  %1224 = vst.msk [vmem:[#allocation0 + $0x75] sm:$0x10] %vm22_vm0, %v1213_v38  }
 0x195   :  { %1226 = vst.msk [vmem:[#allocation0 + $0xf4] sm:$0x20] %vm22_vm0, %v1213_v38   ;;  %1228 = vst.msk [vmem:[#allocation0 + $0x173] sm:$0x40] %vm22_vm0, %v1213_v38  }
 0x196   :  { %1230 = vst.msk [vmem:[#allocation0 + $0x1f2] sm:$0x80] %vm22_vm0, %v1213_v38   ;;  %2486 = vst [vmem:[%s3535_s1 + $0x1f8] sm:$0xf] %v2217_v39 }
 0x197   :  { %2438 = vst [vmem:[%s3535_s1 + $0x138] sm:$0xf] %v1881_v40  ;;  %2446 = vst [vmem:[%s3535_s1 + $0x158] sm:$0xf] %v1937_v41 }
 0x198   :  { %2422 = vst [vmem:[%s3535_s1 + $0xf8] sm:$0xf] %v1769_v44  ;;  %2454 = vst [vmem:[%s3535_s1 + $0x178] sm:$0xf] %v1993_v42 }
 0x199   :  { %2478 = vst [vmem:[%s3535_s1 + $0x1d8] sm:$0xf] %v2161_v43  ;;  %2366 = vst [vmem:[%s3535_s1 + $0x18] sm:$0xf] %v1377_v45 }
 0x19a   :  { %2374 = vst [vmem:[%s3535_s1 + $0x38] sm:$0xf] %v1433_v46  ;;  %2382 = vst [vmem:[%s3535_s1 + $0x58] sm:$0xf] %v1489_v47 }
 0x19b   :  { %2390 = vst [vmem:[%s3535_s1 + $0x78] sm:$0xf] %v1545_v48  ;;  %2398 = vst [vmem:[%s3535_s1 + $0x98] sm:$0xf] %v1601_v49 }
 0x19c   :  { %2406 = vst [vmem:[%s3535_s1 + $0xb8] sm:$0xf] %v1657_v50  ;;  %1278 = vst.msk [vmem:[#allocation0 + $0x23a] sm:$0x1] %vm22_vm0, %v1275_v51  }
 0x19d   :  { %1280 = vst.msk [vmem:[#allocation0 + $0x2b9] sm:$0x2] %vm22_vm0, %v1275_v51   ;;  %1282 = vst.msk [vmem:[#allocation0 + $0x338] sm:$0x4] %vm22_vm0, %v1275_v51  }
 0x19e   :  { %1284 = vst.msk [vmem:[#allocation0 + $0x3b7] sm:$0x8] %vm22_vm0, %v1275_v51   ;;  %1286 = vst.msk [vmem:[#allocation0 + $0x276] sm:$0x10] %vm22_vm0, %v1275_v51  }
 0x19f   :  { %1288 = vst.msk [vmem:[#allocation0 + $0x2f5] sm:$0x20] %vm22_vm0, %v1275_v51   ;;  %1290 = vst.msk [vmem:[#allocation0 + $0x374] sm:$0x40] %vm22_vm0, %v1275_v51  }
 0x1a0   :  { %1292 = vst.msk [vmem:[#allocation0 + $0x3f3] sm:$0x80] %vm22_vm0, %v1275_v51   ;;  %1257 = vst.msk [vmem:[#allocation0 + $0x3a] sm:$0x1] %vm22_vm0, %v1254_v52  }
 0x1a1   :  { %1259 = vst.msk [vmem:[#allocation0 + $0xb9] sm:$0x2] %vm22_vm0, %v1254_v52   ;;  %1261 = vst.msk [vmem:[#allocation0 + $0x138] sm:$0x4] %vm22_vm0, %v1254_v52  }
 0x1a2   :  { %1263 = vst.msk [vmem:[#allocation0 + $0x1b7] sm:$0x8] %vm22_vm0, %v1254_v52   ;;  %1265 = vst.msk [vmem:[#allocation0 + $0x76] sm:$0x10] %vm22_vm0, %v1254_v52  }
 0x1a3   :  { %1267 = vst.msk [vmem:[#allocation0 + $0xf5] sm:$0x20] %vm22_vm0, %v1254_v52   ;;  %1269 = vst.msk [vmem:[#allocation0 + $0x174] sm:$0x40] %vm22_vm0, %v1254_v52  }
 0x1a4   :  { %1271 = vst.msk [vmem:[#allocation0 + $0x1f3] sm:$0x80] %vm22_vm0, %v1254_v52   ;;  %2414 = vst [vmem:[%s3535_s1 + $0xd8] sm:$0xf] %v1713_v53 }
 0x1a5   :  { %1319 = vst.msk [vmem:[#allocation0 + $0x23b] sm:$0x1] %vm22_vm0, %v1316_v54   ;;  %1321 = vst.msk [vmem:[#allocation0 + $0x2ba] sm:$0x2] %vm22_vm0, %v1316_v54  }
 0x1a6   :  { %1323 = vst.msk [vmem:[#allocation0 + $0x339] sm:$0x4] %vm22_vm0, %v1316_v54   ;;  %1325 = vst.msk [vmem:[#allocation0 + $0x3b8] sm:$0x8] %vm22_vm0, %v1316_v54  }
 0x1a7   :  { %1327 = vst.msk [vmem:[#allocation0 + $0x277] sm:$0x10] %vm22_vm0, %v1316_v54   ;;  %1329 = vst.msk [vmem:[#allocation0 + $0x2f6] sm:$0x20] %vm22_vm0, %v1316_v54  }
 0x1a8   :  { %1331 = vst.msk [vmem:[#allocation0 + $0x375] sm:$0x40] %vm22_vm0, %v1316_v54   ;;  %1333 = vst.msk [vmem:[#allocation0 + $0x3f4] sm:$0x80] %vm22_vm0, %v1316_v54  }
 0x1a9   :  { %1298 = vst.msk [vmem:[#allocation0 + $0x3b] sm:$0x1] %vm22_vm0, %v1295_v55   ;;  %1300 = vst.msk [vmem:[#allocation0 + $0xba] sm:$0x2] %vm22_vm0, %v1295_v55  }
 0x1aa   :  { %1302 = vst.msk [vmem:[#allocation0 + $0x139] sm:$0x4] %vm22_vm0, %v1295_v55   ;;  %1304 = vst.msk [vmem:[#allocation0 + $0x1b8] sm:$0x8] %vm22_vm0, %v1295_v55  }
 0x1ab   :  { %1306 = vst.msk [vmem:[#allocation0 + $0x77] sm:$0x10] %vm22_vm0, %v1295_v55   ;;  %1308 = vst.msk [vmem:[#allocation0 + $0xf6] sm:$0x20] %vm22_vm0, %v1295_v55  }
 0x1ac   :  { %1310 = vst.msk [vmem:[#allocation0 + $0x175] sm:$0x40] %vm22_vm0, %v1295_v55   ;;  %1312 = vst.msk [vmem:[#allocation0 + $0x1f4] sm:$0x80] %vm22_vm0, %v1295_v55   ;;  %v1832_v56 = vld [vmem:[#allocation0 + $0x238] sm:$0xf] }
 0x1ad   :  { %v1944_v58 = vld [vmem:[#allocation0 + $0x2b8] sm:$0xf]  ;;  %2431 = vst [vmem:[%s3535_s1 + $0x11c] sm:$0xf] %v1832_v56 }
 0x1ae   :  { %v1888_v57 = vld [vmem:[#allocation0 + $0x278] sm:$0xf]  ;;  %2447 = vst [vmem:[%s3535_s1 + $0x15c] sm:$0xf] %v1944_v58 }
 0x1af   :  { %2439 = vst [vmem:[%s3535_s1 + $0x13c] sm:$0xf] %v1888_v57  ;;  %v2000_v59 = vld [vmem:[#allocation0 + $0x2f8] sm:$0xf] }
 0x1b0   :  { %v2056_v60 = vld [vmem:[#allocation0 + $0x338] sm:$0xf]  ;;  %2455 = vst [vmem:[%s3535_s1 + $0x17c] sm:$0xf] %v2000_v59 }
 0x1b1   :  { %v2112_v61 = vld [vmem:[#allocation0 + $0x378] sm:$0xf]  ;;  %2463 = vst [vmem:[%s3535_s1 + $0x19c] sm:$0xf] %v2056_v60 }
 0x1b2   :  { %2471 = vst [vmem:[%s3535_s1 + $0x1bc] sm:$0xf] %v2112_v61  ;;  %v2168_v62 = vld [vmem:[#allocation0 + $0x3b8] sm:$0xf] }
 0x1b3   :  { %v2224_v63 = vld [vmem:[#allocation0 + $0x3f8] sm:$0xf]  ;;  %2479 = vst [vmem:[%s3535_s1 + $0x1dc] sm:$0xf] %v2168_v62 }
 0x1b4   :  { %v1384_v0 = vld [vmem:[#allocation0 + $0x38] sm:$0xf]  ;;  %2487 = vst [vmem:[%s3535_s1 + $0x1fc] sm:$0xf] %v2224_v63 }
 0x1b5   :  { %2367 = vst [vmem:[%s3535_s1 + $0x1c] sm:$0xf] %v1384_v0  ;;  %v1440_v1 = vld [vmem:[#allocation0 + $0x78] sm:$0xf] }
 0x1b6   :  { %v1496_v2 = vld [vmem:[#allocation0 + $0xb8] sm:$0xf]  ;;  %2375 = vst [vmem:[%s3535_s1 + $0x3c] sm:$0xf] %v1440_v1 }
 0x1b7   :  { %v1552_v3 = vld [vmem:[#allocation0 + $0xf8] sm:$0xf]  ;;  %2383 = vst [vmem:[%s3535_s1 + $0x5c] sm:$0xf] %v1496_v2 }
 0x1b8   :  { %2391 = vst [vmem:[%s3535_s1 + $0x7c] sm:$0xf] %v1552_v3  ;;  %v1608_v4 = vld [vmem:[#allocation0 + $0x138] sm:$0xf] }
 0x1b9   :  { %v1664_v5 = vld [vmem:[#allocation0 + $0x178] sm:$0xf]  ;;  %2399 = vst [vmem:[%s3535_s1 + $0x9c] sm:$0xf] %v1608_v4 }
 0x1ba   :  { %v1720_v6 = vld [vmem:[#allocation0 + $0x1b8] sm:$0xf]  ;;  %2407 = vst [vmem:[%s3535_s1 + $0xbc] sm:$0xf] %v1664_v5 }
 0x1bb   :  { %2415 = vst [vmem:[%s3535_s1 + $0xdc] sm:$0xf] %v1720_v6  ;;  %v1776_v7 = vld [vmem:[#allocation0 + $0x1f8] sm:$0xf] }
 0x1bc   :  { %2423 = vst [vmem:[%s3535_s1 + $0xfc] sm:$0xf] %v1776_v7 }

// kernel: reverse.1
= control target key start
LH: loop header
LB: loop body
LE: loop exit
PB: predicated region body
PF: predicated region fallthrough
CT: control target
= control target key end

     0   :  { %s1352_s0 = inlined_call_operand.vmem [shape: f32[2,4,16,16,7], index: 0, kind: input, shape index: {}]   ;;  %s1353_s1 = inlined_call_operand.vmem [shape: f32[2,4,16,16,7], index: 1, kind: output, shape index: {}]  }
   0x1   :  { %v448_v0 = vld [vmem:[%s1352_s0 + $0x60] sm:$0xff]  ;;  %v451_v2 = vld [vmem:[%s1352_s0 + $0xd0] sm:$0xff]  ;;  %v558_v56 = vld [vmem:[%s1352_s0 + $0x68] sm:$0xff] }
   0x2   :  { %v449_v1 = vld [vmem:[%s1352_s0 + $0x220] sm:$0xff]  ;;  %4 = vst [vmem:[%s1353_s1] sm:$0xff] %v448_v0  ;;  %452 = vst [vmem:[%s1353_s1 + $0x70] sm:$0xff] %v451_v2  ;;  %v453_v3 = vld [vmem:[%s1352_s0 + $0x290] sm:$0xff] }
   0x3   :  { %450 = vst [vmem:[%s1353_s1 + $0x1c0] sm:$0xff] %v449_v1  ;;  %v455_v4 = vld [vmem:[%s1352_s0 + $0x140] sm:$0xff]  ;;  %454 = vst [vmem:[%s1353_s1 + $0x230] sm:$0xff] %v453_v3  ;;  %v459_v6 = vld [vmem:[%s1352_s0 + $0x1b0] sm:$0xff] }
   0x4   :  { %v457_v5 = vld [vmem:[%s1352_s0 + $0x300] sm:$0xff]  ;;  %456 = vst [vmem:[%s1353_s1 + $0xe0] sm:$0xff] %v455_v4  ;;  %v461_v7 = vld [vmem:[%s1352_s0 + $0x370] sm:$0xff]  ;;  %460 = vst [vmem:[%s1353_s1 + $0x150] sm:$0xff] %v459_v6 }
   0x5   :  { %458 = vst [vmem:[%s1353_s1 + $0x2a0] sm:$0xff] %v457_v5  ;;  %v463_v8 = vld [vmem:[%s1352_s0 + $0x50] sm:$0xff]  ;;  %462 = vst [vmem:[%s1353_s1 + $0x310] sm:$0xff] %v461_v7  ;;  %v467_v10 = vld [vmem:[%s1352_s0 + $0xc0] sm:$0xff] }
   0x6   :  { %464 = vst [vmem:[%s1353_s1 + $0x10] sm:$0xff] %v463_v8  ;;  %v465_v9 = vld [vmem:[%s1352_s0 + $0x210] sm:$0xff]  ;;  %v469_v11 = vld [vmem:[%s1352_s0 + $0x280] sm:$0xff]  ;;  %468 = vst [vmem:[%s1353_s1 + $0x80] sm:$0xff] %v467_v10 }
   0x7   :  { %466 = vst [vmem:[%s1353_s1 + $0x1d0] sm:$0xff] %v465_v9  ;;  %470 = vst [vmem:[%s1353_s1 + $0x240] sm:$0xff] %v469_v11  ;;  %v471_v12 = vld [vmem:[%s1352_s0 + $0x130] sm:$0xff]  ;;  %v475_v14 = vld [vmem:[%s1352_s0 + $0x1a0] sm:$0xff] }
   0x8   :  { %v473_v13 = vld [vmem:[%s1352_s0 + $0x2f0] sm:$0xff]  ;;  %472 = vst [vmem:[%s1353_s1 + $0xf0] sm:$0xff] %v471_v12  ;;  %476 = vst [vmem:[%s1353_s1 + $0x160] sm:$0xff] %v475_v14  ;;  %v477_v15 = vld [vmem:[%s1352_s0 + $0x360] sm:$0xff] }
   0x9   :  { %474 = vst [vmem:[%s1353_s1 + $0x2b0] sm:$0xff] %v473_v13  ;;  %v479_v16 = vld [vmem:[%s1352_s0 + $0x40] sm:$0xff]  ;;  %478 = vst [vmem:[%s1353_s1 + $0x320] sm:$0xff] %v477_v15  ;;  %v483_v18 = vld [vmem:[%s1352_s0 + $0xb0] sm:$0xff] }
   0xa   :  { %v481_v17 = vld [vmem:[%s1352_s0 + $0x200] sm:$0xff]  ;;  %480 = vst [vmem:[%s1353_s1 + $0x20] sm:$0xff] %v479_v16  ;;  %v485_v19 = vld [vmem:[%s1352_s0 + $0x270] sm:$0xff]  ;;  %484 = vst [vmem:[%s1353_s1 + $0x90] sm:$0xff] %v483_v18 }
   0xb   :  { %482 = vst [vmem:[%s1353_s1 + $0x1e0] sm:$0xff] %v481_v17  ;;  %v487_v20 = vld [vmem:[%s1352_s0 + $0x120] sm:$0xff]  ;;  %486 = vst [vmem:[%s1353_s1 + $0x250] sm:$0xff] %v485_v19  ;;  %v491_v22 = vld [vmem:[%s1352_s0 + $0x190] sm:$0xff] }
   0xc   :  { %488 = vst [vmem:[%s1353_s1 + $0x100] sm:$0xff] %v487_v20  ;;  %v489_v21 = vld [vmem:[%s1352_s0 + $0x2e0] sm:$0xff]  ;;  %v493_v23 = vld [vmem:[%s1352_s0 + $0x350] sm:$0xff]  ;;  %492 = vst [vmem:[%s1353_s1 + $0x170] sm:$0xff] %v491_v22 }
   0xd   :  { %490 = vst [vmem:[%s1353_s1 + $0x2c0] sm:$0xff] %v489_v21  ;;  %494 = vst [vmem:[%s1353_s1 + $0x330] sm:$0xff] %v493_v23  ;;  %v495_v24 = vld [vmem:[%s1352_s0 + $0x30] sm:$0xff]  ;;  %v499_v26 = vld [vmem:[%s1352_s0 + $0xa0] sm:$0xff] }
   0xe   :  { %v497_v25 = vld [vmem:[%s1352_s0 + $0x1f0] sm:$0xff]  ;;  %496 = vst [vmem:[%s1353_s1 + $0x30] sm:$0xff] %v495_v24  ;;  %500 = vst [vmem:[%s1353_s1 + $0xa0] sm:$0xff] %v499_v26  ;;  %v501_v27 = vld [vmem:[%s1352_s0 + $0x260] sm:$0xff] }
   0xf   :  { %498 = vst [vmem:[%s1353_s1 + $0x1f0] sm:$0xff] %v497_v25  ;;  %v503_v28 = vld [vmem:[%s1352_s0 + $0x110] sm:$0xff]  ;;  %502 = vst [vmem:[%s1353_s1 + $0x260] sm:$0xff] %v501_v27  ;;  %v507_v30 = vld [vmem:[%s1352_s0 + $0x180] sm:$0xff] }
  0x10   :  { %v505_v29 = vld [vmem:[%s1352_s0 + $0x2d0] sm:$0xff]  ;;  %504 = vst [vmem:[%s1353_s1 + $0x110] sm:$0xff] %v503_v28  ;;  %v509_v31 = vld [vmem:[%s1352_s0 + $0x340] sm:$0xff]  ;;  %508 = vst [vmem:[%s1353_s1 + $0x180] sm:$0xff] %v507_v30 }
  0x11   :  { %506 = vst [vmem:[%s1353_s1 + $0x2d0] sm:$0xff] %v505_v29  ;;  %v511_v32 = vld [vmem:[%s1352_s0 + $0x20] sm:$0xff]  ;;  %510 = vst [vmem:[%s1353_s1 + $0x340] sm:$0xff] %v509_v31  ;;  %v515_v34 = vld [vmem:[%s1352_s0 + $0x90] sm:$0xff] }
  0x12   :  { %512 = vst [vmem:[%s1353_s1 + $0x40] sm:$0xff] %v511_v32  ;;  %v513_v33 = vld [vmem:[%s1352_s0 + $0x1e0] sm:$0xff]  ;;  %v517_v35 = vld [vmem:[%s1352_s0 + $0x250] sm:$0xff]  ;;  %516 = vst [vmem:[%s1353_s1 + $0xb0] sm:$0xff] %v515_v34 }
  0x13   :  { %514 = vst [vmem:[%s1353_s1 + $0x200] sm:$0xff] %v513_v33  ;;  %518 = vst [vmem:[%s1353_s1 + $0x270] sm:$0xff] %v517_v35  ;;  %v519_v36 = vld [vmem:[%s1352_s0 + $0x100] sm:$0xff]  ;;  %v523_v38 = vld [vmem:[%s1352_s0 + $0x170] sm:$0xff] }
  0x14   :  { %v521_v37 = vld [vmem:[%s1352_s0 + $0x2c0] sm:$0xff]  ;;  %520 = vst [vmem:[%s1353_s1 + $0x120] sm:$0xff] %v519_v36  ;;  %524 = vst [vmem:[%s1353_s1 + $0x190] sm:$0xff] %v523_v38  ;;  %v525_v39 = vld [vmem:[%s1352_s0 + $0x330] sm:$0xff] }
  0x15   :  { %522 = vst [vmem:[%s1353_s1 + $0x2e0] sm:$0xff] %v521_v37  ;;  %v527_v40 = vld [vmem:[%s1352_s0 + $0x10] sm:$0xff]  ;;  %526 = vst [vmem:[%s1353_s1 + $0x350] sm:$0xff] %v525_v39  ;;  %v531_v42 = vld [vmem:[%s1352_s0 + $0x80] sm:$0xff] }
  0x16   :  { %v529_v41 = vld [vmem:[%s1352_s0 + $0x1d0] sm:$0xff]  ;;  %528 = vst [vmem:[%s1353_s1 + $0x50] sm:$0xff] %v527_v40  ;;  %v533_v43 = vld [vmem:[%s1352_s0 + $0x240] sm:$0xff]  ;;  %532 = vst [vmem:[%s1353_s1 + $0xc0] sm:$0xff] %v531_v42 }
  0x17   :  { %530 = vst [vmem:[%s1353_s1 + $0x210] sm:$0xff] %v529_v41  ;;  %v535_v44 = vld [vmem:[%s1352_s0 + $0xf0] sm:$0xff]  ;;  %534 = vst [vmem:[%s1353_s1 + $0x280] sm:$0xff] %v533_v43  ;;  %v539_v46 = vld [vmem:[%s1352_s0 + $0x160] sm:$0xff] }
  0x18   :  { %536 = vst [vmem:[%s1353_s1 + $0x130] sm:$0xff] %v535_v44  ;;  %v537_v45 = vld [vmem:[%s1352_s0 + $0x2b0] sm:$0xff]  ;;  %v541_v47 = vld [vmem:[%s1352_s0 + $0x320] sm:$0xff]  ;;  %540 = vst [vmem:[%s1353_s1 + $0x1a0] sm:$0xff] %v539_v46 }
  0x19   :  { %538 = vst [vmem:[%s1353_s1 + $0x2f0] sm:$0xff] %v537_v45  ;;  %542 = vst [vmem:[%s1353_s1 + $0x360] sm:$0xff] %v541_v47  ;;  %v193_v48 = vld [vmem:[%s1352_s0] sm:$0xff]  ;;  %v546_v50 = vld [vmem:[%s1352_s0 + $0x70] sm:$0xff] }
  0x1a   :  { %v544_v49 = vld [vmem:[%s1352_s0 + $0x1c0] sm:$0xff]  ;;  %543 = vst [vmem:[%s1353_s1 + $0x60] sm:$0xff] %v193_v48  ;;  %547 = vst [vmem:[%s1353_s1 + $0xd0] sm:$0xff] %v546_v50  ;;  %v548_v51 = vld [vmem:[%s1352_s0 + $0x230] sm:$0xff] }
  0x1b   :  { %545 = vst [vmem:[%s1353_s1 + $0x220] sm:$0xff] %v544_v49  ;;  %v550_v52 = vld [vmem:[%s1352_s0 + $0xe0] sm:$0xff]  ;;  %549 = vst [vmem:[%s1353_s1 + $0x290] sm:$0xff] %v548_v51  ;;  %v554_v54 = vld [vmem:[%s1352_s0 + $0x150] sm:$0xff] }
  0x1c   :  { %v552_v53 = vld [vmem:[%s1352_s0 + $0x2a0] sm:$0xff]  ;;  %551 = vst [vmem:[%s1353_s1 + $0x140] sm:$0xff] %v550_v52  ;;  %v556_v55 = vld [vmem:[%s1352_s0 + $0x310] sm:$0xff]  ;;  %555 = vst [vmem:[%s1353_s1 + $0x1b0] sm:$0xff] %v554_v54 }
  0x1d   :  { %553 = vst [vmem:[%s1353_s1 + $0x300] sm:$0xff] %v552_v53  ;;  %557 = vst [vmem:[%s1353_s1 + $0x370] sm:$0xff] %v556_v55  ;;  %v560_v57 = vld [vmem:[%s1352_s0 + $0x228] sm:$0xff]  ;;  %v562_v58 = vld [vmem:[%s1352_s0 + $0xd8] sm:$0xff] }
  0x1e   :  { %559 = vst [vmem:[%s1353_s1 + $0x8] sm:$0xff] %v558_v56  ;;  %v564_v59 = vld [vmem:[%s1352_s0 + $0x298] sm:$0xff]  ;;  %561 = vst [vmem:[%s1353_s1 + $0x1c8] sm:$0xff] %v560_v57  ;;  %v566_v60 = vld [vmem:[%s1352_s0 + $0x148] sm:$0xff] }
  0x1f   :  { %563 = vst [vmem:[%s1353_s1 + $0x78] sm:$0xff] %v562_v58  ;;  %565 = vst [vmem:[%s1353_s1 + $0x238] sm:$0xff] %v564_v59  ;;  %v568_v61 = vld [vmem:[%s1352_s0 + $0x308] sm:$0xff]  ;;  %v570_v62 = vld [vmem:[%s1352_s0 + $0x1b8] sm:$0xff] }
  0x20   :  { %567 = vst [vmem:[%s1353_s1 + $0xe8] sm:$0xff] %v566_v60  ;;  %569 = vst [vmem:[%s1353_s1 + $0x2a8] sm:$0xff] %v568_v61  ;;  %v572_v63 = vld [vmem:[%s1352_s0 + $0x378] sm:$0xff]  ;;  %v578_v2 = vld [vmem:[%s1352_s0 + $0xc8] sm:$0xff] }
  0x21   :  { %571 = vst [vmem:[%s1353_s1 + $0x158] sm:$0xff] %v570_v62  ;;  %v574_v0 = vld [vmem:[%s1352_s0 + $0x58] sm:$0xff]  ;;  %573 = vst [vmem:[%s1353_s1 + $0x318] sm:$0xff] %v572_v63  ;;  %v580_v3 = vld [vmem:[%s1352_s0 + $0x288] sm:$0xff] }
  0x22   :  { %v576_v1 = vld [vmem:[%s1352_s0 + $0x218] sm:$0xff]  ;;  %575 = vst [vmem:[%s1353_s1 + $0x18] sm:$0xff] %v574_v0  ;;  %579 = vst [vmem:[%s1353_s1 + $0x88] sm:$0xff] %v578_v2  ;;  %v586_v6 = vld [vmem:[%s1352_s0 + $0x1a8] sm:$0xff] }
  0x23   :  { %577 = vst [vmem:[%s1353_s1 + $0x1d8] sm:$0xff] %v576_v1  ;;  %v582_v4 = vld [vmem:[%s1352_s0 + $0x138] sm:$0xff]  ;;  %581 = vst [vmem:[%s1353_s1 + $0x248] sm:$0xff] %v580_v3  ;;  %v588_v7 = vld [vmem:[%s1352_s0 + $0x368] sm:$0xff] }
  0x24   :  { %583 = vst [vmem:[%s1353_s1 + $0xf8] sm:$0xff] %v582_v4  ;;  %v584_v5 = vld [vmem:[%s1352_s0 + $0x2f8] sm:$0xff]  ;;  %587 = vst [vmem:[%s1353_s1 + $0x168] sm:$0xff] %v586_v6  ;;  %v590_v8 = vld [vmem:[%s1352_s0 + $0x48] sm:$0xff] }
  0x25   :  { %585 = vst [vmem:[%s1353_s1 + $0x2b8] sm:$0xff] %v584_v5  ;;  %589 = vst [vmem:[%s1353_s1 + $0x328] sm:$0xff] %v588_v7  ;;  %v592_v9 = vld [vmem:[%s1352_s0 + $0x208] sm:$0xff]  ;;  %v594_v10 = vld [vmem:[%s1352_s0 + $0xb8] sm:$0xff] }
  0x26   :  { %591 = vst [vmem:[%s1353_s1 + $0x28] sm:$0xff] %v590_v8  ;;  %593 = vst [vmem:[%s1353_s1 + $0x1e8] sm:$0xff] %v592_v9  ;;  %v596_v11 = vld [vmem:[%s1352_s0 + $0x278] sm:$0xff]  ;;  %v598_v12 = vld [vmem:[%s1352_s0 + $0x128] sm:$0xff] }
  0x27   :  { %595 = vst [vmem:[%s1353_s1 + $0x98] sm:$0xff] %v594_v10  ;;  %v600_v13 = vld [vmem:[%s1352_s0 + $0x2e8] sm:$0xff]  ;;  %597 = vst [vmem:[%s1353_s1 + $0x258] sm:$0xff] %v596_v11  ;;  %v602_v14 = vld [vmem:[%s1352_s0 + $0x198] sm:$0xff] }
  0x28   :  { %599 = vst [vmem:[%s1353_s1 + $0x108] sm:$0xff] %v598_v12  ;;  %601 = vst [vmem:[%s1353_s1 + $0x2c8] sm:$0xff] %v600_v13  ;;  %v604_v15 = vld [vmem:[%s1352_s0 + $0x358] sm:$0xff]  ;;  %v610_v18 = vld [vmem:[%s1352_s0 + $0xa8] sm:$0xff] }
  0x29   :  { %v606_v16 = vld [vmem:[%s1352_s0 + $0x38] sm:$0xff]  ;;  %603 = vst [vmem:[%s1353_s1 + $0x178] sm:$0xff] %v602_v14  ;;  %605 = vst [vmem:[%s1353_s1 + $0x338] sm:$0xff] %v604_v15  ;;  %v612_v19 = vld [vmem:[%s1352_s0 + $0x268] sm:$0xff] }
  0x2a   :  { %607 = vst [vmem:[%s1353_s1 + $0x38] sm:$0xff] %v606_v16  ;;  %v608_v17 = vld [vmem:[%s1352_s0 + $0x1f8] sm:$0xff]  ;;  %611 = vst [vmem:[%s1353_s1 + $0xa8] sm:$0xff] %v610_v18  ;;  %v618_v22 = vld [vmem:[%s1352_s0 + $0x188] sm:$0xff] }
  0x2b   :  { %609 = vst [vmem:[%s1353_s1 + $0x1f8] sm:$0xff] %v608_v17  ;;  %613 = vst [vmem:[%s1353_s1 + $0x268] sm:$0xff] %v612_v19  ;;  %v614_v20 = vld [vmem:[%s1352_s0 + $0x118] sm:$0xff]  ;;  %v620_v23 = vld [vmem:[%s1352_s0 + $0x348] sm:$0xff] }
  0x2c   :  { %v616_v21 = vld [vmem:[%s1352_s0 + $0x2d8] sm:$0xff]  ;;  %615 = vst [vmem:[%s1353_s1 + $0x118] sm:$0xff] %v614_v20  ;;  %619 = vst [vmem:[%s1353_s1 + $0x188] sm:$0xff] %v618_v22  ;;  %v622_v24 = vld [vmem:[%s1352_s0 + $0x28] sm:$0xff] }
  0x2d   :  { %617 = vst [vmem:[%s1353_s1 + $0x2d8] sm:$0xff] %v616_v21  ;;  %v624_v25 = vld [vmem:[%s1352_s0 + $0x1e8] sm:$0xff]  ;;  %621 = vst [vmem:[%s1353_s1 + $0x348] sm:$0xff] %v620_v23  ;;  %v626_v26 = vld [vmem:[%s1352_s0 + $0x98] sm:$0xff] }
  0x2e   :  { %623 = vst [vmem:[%s1353_s1 + $0x48] sm:$0xff] %v622_v24  ;;  %625 = vst [vmem:[%s1353_s1 + $0x208] sm:$0xff] %v624_v25  ;;  %v628_v27 = vld [vmem:[%s1352_s0 + $0x258] sm:$0xff]  ;;  %v630_v28 = vld [vmem:[%s1352_s0 + $0x108] sm:$0xff] }
  0x2f   :  { %627 = vst [vmem:[%s1353_s1 + $0xb8] sm:$0xff] %v626_v26  ;;  %629 = vst [vmem:[%s1353_s1 + $0x278] sm:$0xff] %v628_v27  ;;  %v632_v29 = vld [vmem:[%s1352_s0 + $0x2c8] sm:$0xff]  ;;  %v634_v30 = vld [vmem:[%s1352_s0 + $0x178] sm:$0xff] }
  0x30   :  { %631 = vst [vmem:[%s1353_s1 + $0x128] sm:$0xff] %v630_v28  ;;  %v636_v31 = vld [vmem:[%s1352_s0 + $0x338] sm:$0xff]  ;;  %633 = vst [vmem:[%s1353_s1 + $0x2e8] sm:$0xff] %v632_v29  ;;  %v642_v34 = vld [vmem:[%s1352_s0 + $0x88] sm:$0xff] }
  0x31   :  { %635 = vst [vmem:[%s1353_s1 + $0x198] sm:$0xff] %v634_v30  ;;  %637 = vst [vmem:[%s1353_s1 + $0x358] sm:$0xff] %v636_v31  ;;  %v638_v32 = vld [vmem:[%s1352_s0 + $0x18] sm:$0xff]  ;;  %v644_v35 = vld [vmem:[%s1352_s0 + $0x248] sm:$0xff] }
  0x32   :  { %v640_v33 = vld [vmem:[%s1352_s0 + $0x1d8] sm:$0xff]  ;;  %639 = vst [vmem:[%s1353_s1 + $0x58] sm:$0xff] %v638_v32  ;;  %643 = vst [vmem:[%s1353_s1 + $0xc8] sm:$0xff] %v642_v34  ;;  %v650_v38 = vld [vmem:[%s1352_s0 + $0x168] sm:$0xff] }
  0x33   :  { %641 = vst [vmem:[%s1353_s1 + $0x218] sm:$0xff] %v640_v33  ;;  %v646_v36 = vld [vmem:[%s1352_s0 + $0xf8] sm:$0xff]  ;;  %645 = vst [vmem:[%s1353_s1 + $0x288] sm:$0xff] %v644_v35  ;;  %v652_v39 = vld [vmem:[%s1352_s0 + $0x328] sm:$0xff] }
  0x34   :  { %v648_v37 = vld [vmem:[%s1352_s0 + $0x2b8] sm:$0xff]  ;;  %647 = vst [vmem:[%s1353_s1 + $0x138] sm:$0xff] %v646_v36  ;;  %v654_v40 = vld [vmem:[%s1352_s0 + $0x8] sm:$0xff]  ;;  %651 = vst [vmem:[%s1353_s1 + $0x1a8] sm:$0xff] %v650_v38 }
  0x35   :  { %649 = vst [vmem:[%s1353_s1 + $0x2f8] sm:$0xff] %v648_v37  ;;  %653 = vst [vmem:[%s1353_s1 + $0x368] sm:$0xff] %v652_v39  ;;  %v656_v41 = vld [vmem:[%s1352_s0 + $0x1c8] sm:$0xff]  ;;  %v658_v42 = vld [vmem:[%s1352_s0 + $0x78] sm:$0xff] }
  0x36   :  { %655 = vst [vmem:[%s1353_s1 + $0x68] sm:$0xff] %v654_v40  ;;  %v660_v43 = vld [vmem:[%s1352_s0 + $0x238] sm:$0xff]  ;;  %657 = vst [vmem:[%s1353_s1 + $0x228] sm:$0xff] %v656_v41  ;;  %v662_v44 = vld [vmem:[%s1352_s0 + $0xe8] sm:$0xff] }
  0x37   :  { %659 = vst [vmem:[%s1353_s1 + $0xd8] sm:$0xff] %v658_v42  ;;  %661 = vst [vmem:[%s1353_s1 + $0x298] sm:$0xff] %v660_v43  ;;  %v664_v45 = vld [vmem:[%s1352_s0 + $0x2a8] sm:$0xff]  ;;  %v666_v46 = vld [vmem:[%s1352_s0 + $0x158] sm:$0xff] }
  0x38   :  { %663 = vst [vmem:[%s1353_s1 + $0x148] sm:$0xff] %v662_v44  ;;  %665 = vst [vmem:[%s1353_s1 + $0x308] sm:$0xff] %v664_v45  ;;  %v668_v47 = vld [vmem:[%s1352_s0 + $0x318] sm:$0xff] }
  0x39   :  { %667 = vst [vmem:[%s1353_s1 + $0x1b8] sm:$0xff] %v666_v46  ;;  %669 = vst [vmem:[%s1353_s1 + $0x378] sm:$0xff] %v668_v47 }

</bundles_post_ra>
